<compile_context>
chip_gen: v7x
topology: tpu7x:2x2x1
jax: 0.10.0
libtpu: 0.0.40
codegen_flags: <defaults>
</compile_context>

<pallas_src>
import functools

import numpy as np
import jax
import jax.numpy as jnp
from jax import lax
from jax.experimental import pallas as pl
from jax.experimental.pallas import tpu as pltpu


# ---------------------------------------------------------------------------
# Network geometry (fixed by the PyTorch module; the 20x20 input is what makes
# fc1's 12*3*3 = 108 flatten size work out).
# ---------------------------------------------------------------------------
HI = WI = 20                 # input spatial
C1, C2 = 6, 12               # conv1 / conv2 output channels
H1 = W1 = 18                 # conv1 VALID output
HP1 = WP1 = 9                # after 2x2/2 max pool
H2 = W2 = 7                  # conv2 VALID output
HP2 = WP2 = 3                # after 2x2/2 max pool
F1, F2, F3 = 80, 40, 10      # fc sizes
K1 = 9                       # 3x3 taps
ROW0 = HI * WI               # dilated rows per image in conv1 coords (400)
ROW2 = ROW0 // 2             # dilated rows per image in conv2 coords (200)

# Row offsets inside the single (312, 128) weight/bias slab.
_W1_R, _W2_R, _WF1_R, _WF2_R, _WF3_R = 0, 16, 72, 184, 264
_B1_R, _B2_R, _BF1_R, _BF2_R, _BF3_R = 304, 305, 306, 307, 308
SLAB_ROWS, SLAB_COLS = 312, 128


def _tile_lengths(T):
    """Dilated-row scratch lengths for a tile of T images (all multiples of 8)."""
    L1 = ROW0 * T            # conv1 output rows (anchor r = t*400 + 20h + w)
    LP1 = L1 - 24            # pool1 output rows (valid anchors r = t*400 + 40ph + 2pw)
    L2 = ROW2 * T - 56       # conv2 output rows (anchor t2 = t*200 + 20h2 + w2)
    LP2 = ROW2 * T - 80      # pool2 output rows (valid anchors u = t*200 + 40p + 2q)
    return L1, LP1, L2, LP2


def _check_geometry(T):
    """Static asserts tying scratch lengths to the max row offsets ever read."""
    L1, LP1, L2, LP2 = _tile_lengths(T)
    assert L1 % 8 == 0 and LP1 % 8 == 0 and L2 % 8 == 0 and LP2 % 8 == 0
    # pool1 store reads a1 rows up to LP1-1+21
    assert LP1 - 1 + (WI + 1) < L1
    # largest pool1 anchor consumed by conv2 taps
    assert (T - 1) * ROW0 + 2 * WI * (HP1 - 1) + 2 * (WP1 - 1) < LP1
    # conv2 im2col stride-2 gather max row in p1
    assert 2 * (2 * WI + 2) + 2 * (L2 - 1) < LP1
    # largest conv2 anchor consumed by pool2 corners
    assert (T - 1) * ROW2 + WI * (H2 - 1) + (W2 - 1) < L2
    # pool2 store reads a2 rows up to LP2-1+21
    assert LP2 - 1 + (WI + 1) < L2
    # largest pool2 anchor consumed by the fc1 gather
    assert (T - 1) * ROW2 + 2 * WI * (HP2 - 1) + 2 * (WP2 - 1) < LP2


# ------------------------------ fused kernel ------------------------------- #

def _fused_forward_kernel(xc_ref, w_ref, out_ref,
                          a1_ref, p1_ref, a2_ref, p2_ref, *, block_batch):
    T = block_batch
    L1, LP1, L2, LP2 = _tile_lengths(T)
    f32 = jnp.float32

    # ---- conv1 (1 -> 6, 3x3 VALID): single MXU matmul over the prologue-built
    # 9-tap im2col.  Rows whose 3x3 window falls outside an image hold garbage
    # and are never read downstream.  Single store of a1.
    w1 = w_ref[_W1_R:_W1_R + K1, :C1]            # [9, 6]
    b1 = w_ref[_B1_R:_B1_R + 1, :C1]             # [1, 6]
    a1_ref[...] = jnp.dot(xc_ref[...], w1, preferred_element_type=f32) + b1

    # ---- maxpool 2x2/2 with ReLU fused (relu commutes with max); corners of
    # anchor r live at r, r+1, r+20, r+21 in the dilated-row space.
    def pool_relu(src_ref, length):
        m = jnp.maximum(
            jnp.maximum(src_ref[pl.ds(0, length), :], src_ref[pl.ds(1, length), :]),
            jnp.maximum(src_ref[pl.ds(WI, length), :],
                        src_ref[pl.ds(WI + 1, length), :]))
        return jnp.maximum(m, 0.0)

    p1_ref[...] = pool_relu(a1_ref, LP1)

    # ---- conv2 (6 -> 12, 3x3 VALID): build the [L2, 54] im2col as a value
    # (9 stride-2 row gathers of p1, concatenated on lanes) and do ONE matmul.
    taps = [p1_ref[pl.ds(2 * (kh * WI + kw), L2, stride=2), :]
            for kh in range(3) for kw in range(3)]
    lhs2 = jnp.concatenate(taps, axis=1)          # [L2, 54], column = tap*6 + cin
    w2 = w_ref[_W2_R:_W2_R + K1 * C1, :C2]        # [54, 12]
    b2 = w_ref[_B2_R:_B2_R + 1, :C2]              # [1, 12]
    a2_ref[...] = jnp.dot(lhs2, w2, preferred_element_type=f32) + b2

    # ---- maxpool 2x2/2 + ReLU.
    p2_ref[...] = pool_relu(a2_ref, LP2)

    # ---- flatten + fc1 (+ReLU): gather the 9 pooled spatial positions once
    # into a compact [T, 108] value (columns ordered spatial-major to match the
    # pre-permuted fc1 weight) and do ONE matmul.
    def batch_rows(off):
        if T == 1:
            return p2_ref[pl.ds(off, 1), :]
        return p2_ref[pl.ds(off, T, stride=ROW2), :]

    flat = jnp.concatenate(
        [batch_rows(2 * WI * ph + 2 * pw) for ph in range(HP2) for pw in range(WP2)],
        axis=1)                                   # [T, 108]

    wf1 = w_ref[_WF1_R:_WF1_R + C2 * HP2 * WP2, :F1]
    bf1 = w_ref[_BF1_R:_BF1_R + 1, :F1]
    h = jnp.maximum(jnp.dot(flat, wf1, preferred_element_type=f32) + bf1, 0.0)

    # ---- fc2 (+ReLU) and fc3.
    wf2 = w_ref[_WF2_R:_WF2_R + F1, :F2]
    bf2 = w_ref[_BF2_R:_BF2_R + 1, :F2]
    h = jnp.maximum(jnp.dot(h, wf2, preferred_element_type=f32) + bf2, 0.0)

    wf3 = w_ref[_WF3_R:_WF3_R + F2, :F3]
    bf3 = w_ref[_BF3_R:_BF3_R + 1, :F3]
    out_ref[0] = (jnp.dot(h, wf3, preferred_element_type=f32) + bf3
                  ).astype(out_ref.dtype)


# ------------------------- parameter flat-vector map ------------------------ #
# Order matches NeuralNetworkForStandardTraining.state_dict().

PARAM_SHAPES = (
    ("conv1_w", (C1, 1, 3, 3)),
    ("conv1_b", (C1,)),
    ("conv2_w", (C2, C1, 3, 3)),
    ("conv2_b", (C2,)),
    ("fc1_w", (F1, C2 * HP2 * WP2)),
    ("fc1_b", (F1,)),
    ("fc2_w", (F2, F1)),
    ("fc2_b", (F2,)),
    ("fc3_w", (F3, F2)),
    ("fc3_b", (F3,)),
)
NUM_PARAMS = sum(int(np.prod(s)) for _, s in PARAM_SHAPES)  # 13090


def unpack_params(flat):
    """Equivalent of transform_tensor_into_state_dict: slice flat vector by shapes."""
    params, c = {}, 0
    for name, shape in PARAM_SHAPES:
        n = int(np.prod(shape))
        params[name] = flat[c:c + n].reshape(shape)
        c += n
    return params


def _prepare_operands(x_nchw, flat_params):
    """Small XLA prologue (1-2 fusions): x 9-tap im2col + one weight/bias slab."""
    batch = x_nchw.shape[0]
    p = unpack_params(flat_params.astype(jnp.float32))

    # x im2col: 9 shifted copies of the flat (b, h, w) pixel stream.  Rows whose
    # 3x3 window crosses an image edge are garbage and never read by the kernel.
    n = batch * ROW0
    x_flat = x_nchw.astype(jnp.float32).reshape(n)
    x_pad = jnp.concatenate([x_flat, jnp.zeros((2 * WI + 2,), jnp.float32)])
    x_im2col = jnp.stack([x_pad[kh * WI + kw: kh * WI + kw + n]
                          for kh in range(3) for kw in range(3)], axis=-1)  # [n, 9]

    # One lane-padded weight/bias slab, matmul-ready (K on rows, N on lanes).
    w1 = p["conv1_w"].reshape(C1, K1).T                                   # [9, 6]
    w2 = jnp.transpose(p["conv2_w"], (2, 3, 1, 0)).reshape(K1 * C1, C2)   # [54, 12]
    # Fold PyTorch's channel-major flatten (idx = c*9 + s) into fc1:
    # rows ordered s*12 + c to match the kernel's gather order.
    wf1 = jnp.transpose(p["fc1_w"].reshape(F1, C2, HP2 * WP2), (2, 1, 0)
                        ).reshape(HP2 * WP2 * C2, F1)                     # [108, 80]
    wf2 = p["fc2_w"].T
    wf3 = p["fc3_w"].T

    slab = jnp.zeros((SLAB_ROWS, SLAB_COLS), jnp.float32)
    slab = slab.at[_W1_R:_W1_R + K1, :C1].set(w1)
    slab = slab.at[_W2_R:_W2_R + K1 * C1, :C2].set(w2)
    slab = slab.at[_WF1_R:_WF1_R + C2 * HP2 * WP2, :F1].set(wf1)
    slab = slab.at[_WF2_R:_WF2_R + F1, :F2].set(wf2)
    slab = slab.at[_WF3_R:_WF3_R + F2, :F3].set(wf3)
    slab = slab.at[_B1_R, :C1].set(p["conv1_b"])
    slab = slab.at[_B2_R, :C2].set(p["conv2_b"])
    slab = slab.at[_BF1_R, :F1].set(p["fc1_b"])
    slab = slab.at[_BF2_R, :F2].set(p["fc2_b"])
    slab = slab.at[_BF3_R, :F3].set(p["fc3_b"])
    return x_im2col, slab


# ------------------------------ forward pass ------------------------------- #

def neural_network_for_learning(x_nchw, neural_net_parameters, *, block_batch=1):
    """Pallas TPU implementation of NeuralNetworkForLearning.forward."""
    batch = x_nchw.shape[0]
    assert x_nchw.shape[1:] == (1, HI, WI), x_nchw.shape
    assert batch % block_batch == 0, (batch, block_batch)
    T = block_batch
    nb = batch // T
    _check_geometry(T)
    L1, LP1, L2, LP2 = _tile_lengths(T)

    x_im2col, slab = _prepare_operands(x_nchw, neural_net_parameters)

    out = pl.pallas_call(
        functools.partial(_fused_forward_kernel, block_batch=T),
        out_shape=jax.ShapeDtypeStruct((nb, T, F3), jnp.float32),
        grid=(nb,),
        in_specs=[
            pl.BlockSpec((T * ROW0, K1), lambda i: (i, 0)),        # x im2col tile
            pl.BlockSpec((SLAB_ROWS, SLAB_COLS), lambda i: (0, 0)),  # weight slab
        ],
        out_specs=pl.BlockSpec((1, T, F3), lambda i: (i, 0, 0)),
        scratch_shapes=[
            pltpu.VMEM((L1, C1), jnp.float32),    # conv1 output (dilated rows)
            pltpu.VMEM((LP1, C1), jnp.float32),   # pool1 output
            pltpu.VMEM((L2, C2), jnp.float32),    # conv2 output
            pltpu.VMEM((LP2, C2), jnp.float32),   # pool2 output
        ],
        compiler_params=pltpu.CompilerParams(
            dimension_semantics=("parallel",)),   # batch tiles split across TCs (v7x)
    )(x_im2col, slab)
    return out.reshape(batch, F3)


def reference_forward(x_nchw, neural_net_parameters):
    """Pure-JAX (XLA) reference mirroring the PyTorch forward, for validation."""
    p = unpack_params(neural_net_parameters)
    prec = lax.Precision.HIGHEST

    def conv_relu(x, w, b):
        y = lax.conv_general_dilated(
            x, w, (1, 1), "VALID",
            dimension_numbers=("NCHW", "OIHW", "NCHW"), precision=prec)
        return jnp.maximum(y + b[None, :, None, None], 0.0)

    def pool(x):
        return lax.reduce_window(x, -jnp.inf, lax.max,
                                 (1, 1, 2, 2), (1, 1, 2, 2), "VALID")

    x = pool(conv_relu(x_nchw, p["conv1_w"], p["conv1_b"]))
    x = pool(conv_relu(x, p["conv2_w"], p["conv2_b"]))
    x = x.reshape(x.shape[0], -1)
    x = jnp.maximum(jnp.dot(x, p["fc1_w"].T, precision=prec) + p["fc1_b"], 0.0)
    x = jnp.maximum(jnp.dot(x, p["fc2_w"].T, precision=prec) + p["fc2_b"], 0.0)
    return jnp.dot(x, p["fc3_w"].T, precision=prec) + p["fc3_b"]


# ---------------------------------- main ----------------------------------- #

if __name__ == "__main__":
    key = jax.random.PRNGKey(0)
    kx, kp = jax.random.split(key)

    batch = 2
    # 20x20 input is what makes fc1's 12*3*3 = 108 flatten size work out.
    x = jax.random.normal(kx, (batch, 1, HI, WI), dtype=jnp.float32)
    neural_net_parameters = (
        jax.random.normal(kp, (NUM_PARAMS,), dtype=jnp.float32) * 0.05
    )

    fwd = jax.jit(functools.partial(neural_network_for_learning, block_batch=1))
    out = jax.block_until_ready(fwd(x, neural_net_parameters))
    assert out.shape == (batch, F3) and out.dtype == jnp.float32

    ref = reference_forward(x, neural_net_parameters)
    # Tighter than before; not 1e-5 because the MXU may run f32 matmuls in
    # bf16-pass mode, while the reference is computed at HIGHEST precision.
    np.testing.assert_allclose(np.asarray(out), np.asarray(ref),
                               rtol=1e-2, atol=2e-3)

    print("KERNEL_OK")
</pallas_src>

<mosaic_0001>
module attributes {stable_mosaic.version = 11 : i64} {
  func.func @_fused_forward_kernel(%arg0: i32, %arg1: memref<400x9xf32, #tpu.memory_space<vmem>>, %arg2: memref<312x128xf32, #tpu.memory_space<vmem>>, %arg3: memref<1x1x10xf32, #tpu.memory_space<vmem>>, %arg4: memref<400x6xf32, #tpu.memory_space<vmem>>, %arg5: memref<376x6xf32, #tpu.memory_space<vmem>>, %arg6: memref<144x12xf32, #tpu.memory_space<vmem>>, %arg7: memref<120x12xf32, #tpu.memory_space<vmem>>) attributes {dimension_semantics = [#tpu.dimension_semantics<parallel>], iteration_bounds = array<i64: 2>, scalar_prefetch = 0 : i64, scratch_operands = 4 : i64, tpu.core_type = #tpu.core_type<tc>, window_params = [{transform_indices = @transform_0, window_bounds = array<i64: 400, 9>}, {pipeline_mode = #tpu.pipeline_mode<synchronous>, transform_indices = @transform_1, window_bounds = array<i64: 312, 128>}, {transform_indices = @transform_2, window_bounds = array<i64: 1, 1, 10>}]} {
    %c0 = arith.constant 0 : index
    %c0_0 = arith.constant 0 : index
    %0 = vector.load %arg2[%c0, %c0_0] : memref<312x128xf32, #tpu.memory_space<vmem>>, vector<9x6xf32>
    %c304 = arith.constant 304 : index
    %c0_1 = arith.constant 0 : index
    %1 = vector.load %arg2[%c304, %c0_1] : memref<312x128xf32, #tpu.memory_space<vmem>>, vector<1x6xf32>
    %c0_2 = arith.constant 0 : index
    %c0_3 = arith.constant 0 : index
    %2 = vector.load %arg1[%c0_2, %c0_3] : memref<400x9xf32, #tpu.memory_space<vmem>>, vector<400x9xf32>
    %cst = arith.constant dense<0.000000e+00> : vector<400x6xf32>
    %3 = tpu.matmul %2, %0, %cst {dimension_numbers = #tpu.dot_dimension_numbers<[1], [0], [0], [1], [0, 0, 1, 1], [], []>} : vector<400x9xf32>, vector<9x6xf32>, vector<400x6xf32> -> vector<400x6xf32>
    %4 = vector.broadcast %1 : vector<1x6xf32> to vector<400x6xf32>
    %5 = arith.addf %3, %4 : vector<400x6xf32>
    %c0_4 = arith.constant 0 : index
    %c0_5 = arith.constant 0 : index
    %6 = vector.load %arg4[%c0_4, %c0_5] : memref<400x6xf32, #tpu.memory_space<vmem>>, vector<400x6xf32>
    tpu.vector_store %arg4[%c0_4, %c0_5], %5 {strides = array<i32>} : memref<400x6xf32, #tpu.memory_space<vmem>>, vector<400x6xf32>,
    %c0_6 = arith.constant 0 : index
    %c0_7 = arith.constant 0 : index
    %7 = vector.load %arg4[%c0_6, %c0_7] : memref<400x6xf32, #tpu.memory_space<vmem>>, vector<376x6xf32>
    %c1 = arith.constant 1 : index
    %c0_8 = arith.constant 0 : index
    %8 = vector.load %arg4[%c1, %c0_8] : memref<400x6xf32, #tpu.memory_space<vmem>>, vector<376x6xf32>
    %9 = arith.maximumf %7, %8 : vector<376x6xf32>
    %c20 = arith.constant 20 : index
    %c0_9 = arith.constant 0 : index
    %10 = vector.load %arg4[%c20, %c0_9] : memref<400x6xf32, #tpu.memory_space<vmem>>, vector<376x6xf32>
    %c21 = arith.constant 21 : index
    %c0_10 = arith.constant 0 : index
    %11 = vector.load %arg4[%c21, %c0_10] : memref<400x6xf32, #tpu.memory_space<vmem>>, vector<376x6xf32>
    %12 = arith.maximumf %10, %11 : vector<376x6xf32>
    %13 = arith.maximumf %9, %12 : vector<376x6xf32>
    %cst_11 = arith.constant 0.000000e+00 : f32
    %14 = vector.broadcast %cst_11 : f32 to vector<376x6xf32>
    %15 = arith.maximumf %13, %14 : vector<376x6xf32>
    %c0_12 = arith.constant 0 : index
    %c0_13 = arith.constant 0 : index
    %16 = vector.load %arg5[%c0_12, %c0_13] : memref<376x6xf32, #tpu.memory_space<vmem>>, vector<376x6xf32>
    tpu.vector_store %arg5[%c0_12, %c0_13], %15 {strides = array<i32>} : memref<376x6xf32, #tpu.memory_space<vmem>>, vector<376x6xf32>,
    %c0_14 = arith.constant 0 : index
    %c0_15 = arith.constant 0 : index
    %17 = tpu.strided_load %arg5[%c0_14, %c0_15] {strides = array<i32: 2, 1>} : memref<376x6xf32, #tpu.memory_space<vmem>>, vector<144x6xf32>
    %c2 = arith.constant 2 : index
    %c0_16 = arith.constant 0 : index
    %18 = tpu.strided_load %arg5[%c2, %c0_16] {strides = array<i32: 2, 1>} : memref<376x6xf32, #tpu.memory_space<vmem>>, vector<144x6xf32>
    %c4 = arith.constant 4 : index
    %c0_17 = arith.constant 0 : index
    %19 = tpu.strided_load %arg5[%c4, %c0_17] {strides = array<i32: 2, 1>} : memref<376x6xf32, #tpu.memory_space<vmem>>, vector<144x6xf32>
    %c40 = arith.constant 40 : index
    %c0_18 = arith.constant 0 : index
    %20 = tpu.strided_load %arg5[%c40, %c0_18] {strides = array<i32: 2, 1>} : memref<376x6xf32, #tpu.memory_space<vmem>>, vector<144x6xf32>
    %c42 = arith.constant 42 : index
    %c0_19 = arith.constant 0 : index
    %21 = tpu.strided_load %arg5[%c42, %c0_19] {strides = array<i32: 2, 1>} : memref<376x6xf32, #tpu.memory_space<vmem>>, vector<144x6xf32>
    %c44 = arith.constant 44 : index
    %c0_20 = arith.constant 0 : index
    %22 = tpu.strided_load %arg5[%c44, %c0_20] {strides = array<i32: 2, 1>} : memref<376x6xf32, #tpu.memory_space<vmem>>, vector<144x6xf32>
    %c80 = arith.constant 80 : index
    %c0_21 = arith.constant 0 : index
    %23 = tpu.strided_load %arg5[%c80, %c0_21] {strides = array<i32: 2, 1>} : memref<376x6xf32, #tpu.memory_space<vmem>>, vector<144x6xf32>
    %c82 = arith.constant 82 : index
    %c0_22 = arith.constant 0 : index
    %24 = tpu.strided_load %arg5[%c82, %c0_22] {strides = array<i32: 2, 1>} : memref<376x6xf32, #tpu.memory_space<vmem>>, vector<144x6xf32>
    %c84 = arith.constant 84 : index
    %c0_23 = arith.constant 0 : index
    %25 = tpu.strided_load %arg5[%c84, %c0_23] {strides = array<i32: 2, 1>} : memref<376x6xf32, #tpu.memory_space<vmem>>, vector<144x6xf32>
    %26 = tpu.concatenate %17, %18, %19, %20, %21, %22, %23, %24, %25 in 1 : vector<144x6xf32>, vector<144x6xf32>, vector<144x6xf32>, vector<144x6xf32>, vector<144x6xf32>, vector<144x6xf32>, vector<144x6xf32>, vector<144x6xf32>, vector<144x6xf32> -> vector<144x54xf32>
    %c16 = arith.constant 16 : index
    %c0_24 = arith.constant 0 : index
    %27 = vector.load %arg2[%c16, %c0_24] : memref<312x128xf32, #tpu.memory_space<vmem>>, vector<54x12xf32>
    %c305 = arith.constant 305 : index
    %c0_25 = arith.constant 0 : index
    %28 = vector.load %arg2[%c305, %c0_25] : memref<312x128xf32, #tpu.memory_space<vmem>>, vector<1x12xf32>
    %cst_26 = arith.constant dense<0.000000e+00> : vector<144x12xf32>
    %29 = tpu.matmul %26, %27, %cst_26 {dimension_numbers = #tpu.dot_dimension_numbers<[1], [0], [0], [1], [0, 0, 1, 1], [], []>} : vector<144x54xf32>, vector<54x12xf32>, vector<144x12xf32> -> vector<144x12xf32>
    %30 = vector.broadcast %28 : vector<1x12xf32> to vector<144x12xf32>
    %31 = arith.addf %29, %30 : vector<144x12xf32>
    %c0_27 = arith.constant 0 : index
    %c0_28 = arith.constant 0 : index
    %32 = vector.load %arg6[%c0_27, %c0_28] : memref<144x12xf32, #tpu.memory_space<vmem>>, vector<144x12xf32>
    tpu.vector_store %arg6[%c0_27, %c0_28], %31 {strides = array<i32>} : memref<144x12xf32, #tpu.memory_space<vmem>>, vector<144x12xf32>,
    %c0_29 = arith.constant 0 : index
    %c0_30 = arith.constant 0 : index
    %33 = vector.load %arg6[%c0_29, %c0_30] : memref<144x12xf32, #tpu.memory_space<vmem>>, vector<120x12xf32>
    %c1_31 = arith.constant 1 : index
    %c0_32 = arith.constant 0 : index
    %34 = vector.load %arg6[%c1_31, %c0_32] : memref<144x12xf32, #tpu.memory_space<vmem>>, vector<120x12xf32>
    %35 = arith.maximumf %33, %34 : vector<120x12xf32>
    %c20_33 = arith.constant 20 : index
    %c0_34 = arith.constant 0 : index
    %36 = vector.load %arg6[%c20_33, %c0_34] : memref<144x12xf32, #tpu.memory_space<vmem>>, vector<120x12xf32>
    %c21_35 = arith.constant 21 : index
    %c0_36 = arith.constant 0 : index
    %37 = vector.load %arg6[%c21_35, %c0_36] : memref<144x12xf32, #tpu.memory_space<vmem>>, vector<120x12xf32>
    %38 = arith.maximumf %36, %37 : vector<120x12xf32>
    %39 = arith.maximumf %35, %38 : vector<120x12xf32>
    %cst_37 = arith.constant 0.000000e+00 : f32
    %40 = vector.broadcast %cst_37 : f32 to vector<120x12xf32>
    %41 = arith.maximumf %39, %40 : vector<120x12xf32>
    %c0_38 = arith.constant 0 : index
    %c0_39 = arith.constant 0 : index
    %42 = vector.load %arg7[%c0_38, %c0_39] : memref<120x12xf32, #tpu.memory_space<vmem>>, vector<120x12xf32>
    tpu.vector_store %arg7[%c0_38, %c0_39], %41 {strides = array<i32>} : memref<120x12xf32, #tpu.memory_space<vmem>>, vector<120x12xf32>,
    %c0_40 = arith.constant 0 : index
    %c0_41 = arith.constant 0 : index
    %43 = vector.load %arg7[%c0_40, %c0_41] : memref<120x12xf32, #tpu.memory_space<vmem>>, vector<1x12xf32>
    %c2_42 = arith.constant 2 : index
    %c0_43 = arith.constant 0 : index
    %44 = vector.load %arg7[%c2_42, %c0_43] : memref<120x12xf32, #tpu.memory_space<vmem>>, vector<1x12xf32>
    %c4_44 = arith.constant 4 : index
    %c0_45 = arith.constant 0 : index
    %45 = vector.load %arg7[%c4_44, %c0_45] : memref<120x12xf32, #tpu.memory_space<vmem>>, vector<1x12xf32>
    %c40_46 = arith.constant 40 : index
    %c0_47 = arith.constant 0 : index
    %46 = vector.load %arg7[%c40_46, %c0_47] : memref<120x12xf32, #tpu.memory_space<vmem>>, vector<1x12xf32>
    %c42_48 = arith.constant 42 : index
    %c0_49 = arith.constant 0 : index
    %47 = vector.load %arg7[%c42_48, %c0_49] : memref<120x12xf32, #tpu.memory_space<vmem>>, vector<1x12xf32>
    %c44_50 = arith.constant 44 : index
    %c0_51 = arith.constant 0 : index
    %48 = vector.load %arg7[%c44_50, %c0_51] : memref<120x12xf32, #tpu.memory_space<vmem>>, vector<1x12xf32>
    %c80_52 = arith.constant 80 : index
    %c0_53 = arith.constant 0 : index
    %49 = vector.load %arg7[%c80_52, %c0_53] : memref<120x12xf32, #tpu.memory_space<vmem>>, vector<1x12xf32>
    %c82_54 = arith.constant 82 : index
    %c0_55 = arith.constant 0 : index
    %50 = vector.load %arg7[%c82_54, %c0_55] : memref<120x12xf32, #tpu.memory_space<vmem>>, vector<1x12xf32>
    %c84_56 = arith.constant 84 : index
    %c0_57 = arith.constant 0 : index
    %51 = vector.load %arg7[%c84_56, %c0_57] : memref<120x12xf32, #tpu.memory_space<vmem>>, vector<1x12xf32>
    %52 = tpu.concatenate %43, %44, %45, %46, %47, %48, %49, %50, %51 in 1 : vector<1x12xf32>, vector<1x12xf32>, vector<1x12xf32>, vector<1x12xf32>, vector<1x12xf32>, vector<1x12xf32>, vector<1x12xf32>, vector<1x12xf32>, vector<1x12xf32> -> vector<1x108xf32>
    %c72 = arith.constant 72 : index
    %c0_58 = arith.constant 0 : index
    %53 = vector.load %arg2[%c72, %c0_58] : memref<312x128xf32, #tpu.memory_space<vmem>>, vector<108x80xf32>
    %c306 = arith.constant 306 : index
    %c0_59 = arith.constant 0 : index
    %54 = vector.load %arg2[%c306, %c0_59] : memref<312x128xf32, #tpu.memory_space<vmem>>, vector<1x80xf32>
    %cst_60 = arith.constant dense<0.000000e+00> : vector<1x80xf32>
    %55 = tpu.matmul %52, %53, %cst_60 {dimension_numbers = #tpu.dot_dimension_numbers<[1], [0], [0], [1], [0, 0, 1, 1], [], []>} : vector<1x108xf32>, vector<108x80xf32>, vector<1x80xf32> -> vector<1x80xf32>
    %56 = arith.addf %55, %54 : vector<1x80xf32>
    %cst_61 = arith.constant 0.000000e+00 : f32
    %57 = vector.broadcast %cst_61 : f32 to vector<1x80xf32>
    %58 = arith.maximumf %56, %57 : vector<1x80xf32>
    %c184 = arith.constant 184 : index
    %c0_62 = arith.constant 0 : index
    %59 = vector.load %arg2[%c184, %c0_62] : memref<312x128xf32, #tpu.memory_space<vmem>>, vector<80x40xf32>
    %c307 = arith.constant 307 : index
    %c0_63 = arith.constant 0 : index
    %60 = vector.load %arg2[%c307, %c0_63] : memref<312x128xf32, #tpu.memory_space<vmem>>, vector<1x40xf32>
    %cst_64 = arith.constant dense<0.000000e+00> : vector<1x40xf32>
    %61 = tpu.matmul %58, %59, %cst_64 {dimension_numbers = #tpu.dot_dimension_numbers<[1], [0], [0], [1], [0, 0, 1, 1], [], []>} : vector<1x80xf32>, vector<80x40xf32>, vector<1x40xf32> -> vector<1x40xf32>
    %62 = arith.addf %61, %60 : vector<1x40xf32>
    %cst_65 = arith.constant 0.000000e+00 : f32
    %63 = vector.broadcast %cst_65 : f32 to vector<1x40xf32>
    %64 = arith.maximumf %62, %63 : vector<1x40xf32>
    %c264 = arith.constant 264 : index
    %c0_66 = arith.constant 0 : index
    %65 = vector.load %arg2[%c264, %c0_66] : memref<312x128xf32, #tpu.memory_space<vmem>>, vector<40x10xf32>
    %c308 = arith.constant 308 : index
    %c0_67 = arith.constant 0 : index
    %66 = vector.load %arg2[%c308, %c0_67] : memref<312x128xf32, #tpu.memory_space<vmem>>, vector<1x10xf32>
    %cst_68 = arith.constant dense<0.000000e+00> : vector<1x10xf32>
    %67 = tpu.matmul %64, %65, %cst_68 {dimension_numbers = #tpu.dot_dimension_numbers<[1], [0], [0], [1], [0, 0, 1, 1], [], []>} : vector<1x40xf32>, vector<40x10xf32>, vector<1x10xf32> -> vector<1x10xf32>
    %68 = arith.addf %67, %66 : vector<1x10xf32>
    %c0_69 = arith.constant 0 : index
    %c0_70 = arith.constant 0 : index
    %c0_71 = arith.constant 0 : index
    %69 = vector.load %arg3[%c0_69, %c0_70, %c0_71] : memref<1x1x10xf32, #tpu.memory_space<vmem>>, vector<1x1x10xf32>
    %70 = vector.shape_cast %69 : vector<1x1x10xf32> to vector<1x10xf32>
    %71 = vector.shape_cast %68 : vector<1x10xf32> to vector<1x1x10xf32>
    tpu.vector_store %arg3[%c0_69, %c0_70, %c0_71], %71 {strides = array<i32>} : memref<1x1x10xf32, #tpu.memory_space<vmem>>, vector<1x1x10xf32>,
    return
  }
  func.func @transform_0(%arg0: i32) -> (i32, i32) {
    %c0_i32 = arith.constant 0 : i32
    %c0_i32_0 = arith.constant 0 : i32
    return %arg0, %c0_i32 : i32, i32
  }
  func.func @transform_1(%arg0: i32) -> (i32, i32) {
    %c0_i32 = arith.constant 0 : i32
    %c0_i32_0 = arith.constant 0 : i32
    %c0_i32_1 = arith.constant 0 : i32
    return %c0_i32, %c0_i32_0 : i32, i32
  }
  func.func @transform_2(%arg0: i32) -> (i32, i32, i32) {
    %c0_i32 = arith.constant 0 : i32
    %c0_i32_0 = arith.constant 0 : i32
    %c0_i32_1 = arith.constant 0 : i32
    return %arg0, %c0_i32, %c0_i32_0 : i32, i32, i32
  }
}

</mosaic_0001>

<bundles_post_ra>
// kernel: neural_network_for_learning.1
= control target key start
LH: loop header
LB: loop body
LE: loop exit
PB: predicated region body
PF: predicated region fallthrough
CT: control target
= control target key end

     0   :  { %7 = vsyncpa [#allocation7], 0  ;;  %s4560_s0 = inlined_call_operand.vmem [shape: f32[800,9], index: 0, kind: input, shape index: {}]   ;;  %s4561_s1 = inlined_call_operand.vmem [shape: f32[312,128], index: 1, kind: input, shape index: {}]   ;;  %s4562_s2 = inlined_call_operand.hbm [shape: f32[2,1,10], index: 2, kind: output, shape index: {}]  }
   0x1   :  { %9 = vsyncpa [#allocation7 + $0x1], 0  ;;  %s3448_s9 = smov 0   ;;  %s3450_s10 = smov 0  }
   0x2   :  { %s3452_s11 = smov 0   ;;  %s3454_s12 = smov 0  }
   0x3 LB: > { %s3469_s13 = sadd.s32 4294967295, %s3414_s12   ;;  %s2852_s14 = sadd.s32 4294967294, %s3414_s12   ;;  %s3414_s12 = sphi %s3454_s12, %s4568_s12   ;;  %s3410_s11 = sphi %s3452_s11, %s4567_s11   ;;  %s3406_s10 = sphi %s3450_s10, %s4566_s10   ;;  %s3402_s9 = sphi %s3448_s9, %s4565_s9  }
   0x4   : > { %s3473_s15 = sadd.s32 1, %s3414_s12   ;;  %s69_s16 = sadd.s32 1, %s3410_s11 }
   0x5   : > { %s66_s17 = ssub.s32 %s3414_s12, %s3473_s15  ;;  %p79_p0 = scmp.ne.s32.totalorder %s3410_s11, %s3406_s10 }
   0x6   : > { %p67_p1 = scmp.eq.s32.totalorder %s66_s17, 0  ;;  %p80_p2 = scmp.eq.s32.totalorder %s3469_s13, 1 }
   0x7   : > { %p85_p3 = scmp.ne.s32.totalorder %s3406_s10, %s3402_s9  ;;  %p86_p4 = scmp.eq.s32.totalorder %s2852_s14, 1 }
   0x8   : > { %s3484_s18 = scalar_select %p67_p1, %s3410_s11, %s69_s16  }
   0x9   : > { %p3486_p5 = por %p80_p2, %p79_p0  ;;  %p3490_p6 = por %p86_p4, %p85_p3 }
   0xa   : > { %p2855_p7 = scmp.ge.s32.totalorder %s3414_s12, 1  ;;  %p116_p8 = scmp.lt.s32.totalorder %s3414_s12, 3 }
   0xc   : > { %p117_p9 = pnand %p2855_p7, %p116_p8 }
   0xd   : > { %v143_v0 = vld [vmem:[%s4561_s1] sm:$0xff] (!%p117_p9)  ;;  %v144_v1 = vld [vmem:[%s4561_s1 + $0x8] sm:$0x1] (!%p117_p9)  ;;  %vm351_vm0 = vcmask (!%p117_p9), 1040384   ;;  %vm3416_vm1 = vmmov (!%p117_p9), 1   ;;  %s137_s25 = smul.u32 (!%p117_p9), 50, %s3469_s13 }
   0xe   : > { %120 = sbr.rel (%p117_p9) target bundleno = 1634 (0x662), region = 28  ;;  %v3232_v2 = vpack.c.bf16 (!%p117_p9), %v144_v1, %v143_v0  ;;  %vm3233_vm2 = vmpackc.low (!%p117_p9), %vm351_vm0, %vm3416_vm1  ;;  %vm200_vm3 = vcmask (!%p117_p9), 72704   ;;  %v3612_v53 = vld [vmem:[%s4561_s1 + $0x130] ss:$0 sm:$0xff] (!%p117_p9)  ;;  %vm670_vm4 = vcmask (!%p117_p9), 48128   ;;  %s3417_s4 = smov (!%p117_p9), 12  }
   0xf   : > { %p138_p10 = scmp.lt.s32.totalorder (!%p117_p9), %s137_s25, 99  ;;  %s3418_s5 = smov (!%p117_p9), 6   ;;  %vm2157_vm5 = vcmask (!%p117_p9), 1045504   ;;  %vm1957_vm6 = vcmask (!%p117_p9), 97280   ;;  %vm1976_vm7 = vcmask (!%p117_p9), 146432   ;;  %vm1995_vm8 = vcmask (!%p117_p9), 195584  }
  0x10   : > { %3234 = vmatprep.subr.msk.bf16.mxu0 (!%p117_p9), %vm3233_vm2, %v3232_v2  ;;  %3293 = vmatprep.subr.msk.bf16.mxu1 (!%p117_p9), %vm3233_vm2, %v3232_v2  ;;  %s3419_s6 = smov (!%p117_p9), 18   ;;  %s3420_s7 = smov (!%p117_p9), 24   ;;  %vm2014_vm9 = vcmask (!%p117_p9), 244736   ;;  %vm2033_vm10 = vcmask (!%p117_p9), 293888   ;;  %vm2052_vm11 = vcmask (!%p117_p9), 343040   ;;  %vm2071_vm12 = vcmask (!%p117_p9), 392192  }
  0x11   : > { %3237 = vmatpush3.bf16.msk.msra.mxu0 (!%p117_p9), %vm3233_vm2, %v3232_v2  ;;  %3294 = vmatpush3.bf16.msk.msra.mxu1 (!%p117_p9), %vm3233_vm2, %v3232_v2  ;;  %s3421_s8 = smov (!%p117_p9), 30   ;;  %s3422_s14 = smov (!%p117_p9), 36   ;;  %vm2102_vm13 = vcmask (!%p117_p9), 441344   ;;  %vm2541_vm14 = vcmask (!%p117_p9), 1043456   ;;  %vm3427_vm0 = vmmov (!%p117_p9), 0   ;;  %vm2516_vm2 = vcmask (!%p117_p9), 588800  }
  0x12   : > { %s3423_s16 = smov (!%p117_p9), 42   ;;  %s3424_s17 = smov (!%p117_p9), 48   ;;  %vm3270_vm15 = vmpackc.low (!%p117_p9), %vm2541_vm14, %vm3416_vm1  ;;  %vm2514_vm1 = vcmask (!%p117_p9), 490496  }
  0x13   : > { %s3429_s21 = smov (!%p117_p9), 84   ;;  %s3430_s22 = smov (!%p117_p9), 72  }
  0x14   : > { %s3431_s23 = smov (!%p117_p9), 96   ;;  %s135_s3 = sand.u32 (!%p117_p9), 1, %s3406_s10  }
  0x15   : > { %s4570_s25 = smov (!%p138_p10, %s137_s25), 99  ;;  %s136_s24 = scalar_lea.vmem [#allocation6], %s135_s3 }
  0x16   : > { %s2856_s26 = sshll.u32 %s4570_s25, 3  ;;  %s2797_s25 = sshll.u32 %s136_s24, 4  ;;  %s4520_s25 = int_to_ptr.vmem [resolvable:$true] %s2797_s25 }
  0x17   : > { %s3507_s29 = scalar_lea.vmem %s4560_s0, %s2856_s26 }
  0x18   : > { %v146_v3 = vld [vmem:[%s3507_s29] sm:$0xff]  ;;  %v147_v4 = vld [vmem:[%s3507_s29 + $0x8] sm:$0xff]  ;;  %v148_v5 = vld [vmem:[%s3507_s29 + $0x10] sm:$0xff] }
  0x19   : > { %3049 = vmatprep.mubr.msk.f32.mxu0 %vm200_vm3, %v146_v3  ;;  %v149_v6 = vld [vmem:[%s3507_s29 + $0x18] sm:$0xff]  ;;  %v150_v7 = vld [vmem:[%s3507_s29 + $0x20] sm:$0xff]  ;;  %v151_v8 = vld [vmem:[%s3507_s29 + $0x28] sm:$0xff] }
  0x1a   : > { %3050 = vmatmul.mubr.msk.f32.vlgmr.msra.gmra.mrb[0].mxu0 %vm200_vm3, %v147_v4  ;;  %v152_v9 = vld [vmem:[%s3507_s29 + $0x30] sm:$0xff]  ;;  %v153_v10 = vld [vmem:[%s3507_s29 + $0x38] sm:$0xff]  ;;  %v154_v11 = vld [vmem:[%s3507_s29 + $0x40] sm:$0xff] }
  0x1b   : > { %3052 = vmatprep.mubr.msk.f32.mxu0 %vm200_vm3, %v148_v5  ;;  %v155_v12 = vld [vmem:[%s3507_s29 + $0x48] sm:$0xff]  ;;  %v156_v13 = vld [vmem:[%s3507_s29 + $0x50] sm:$0xff]  ;;  %v157_v14 = vld [vmem:[%s3507_s29 + $0x58] sm:$0xff] }
  0x1c   : > { %v158_v15 = vld [vmem:[%s3507_s29 + $0x60] sm:$0xff]  ;;  %v159_v16 = vld [vmem:[%s3507_s29 + $0x68] sm:$0xff]  ;;  %v160_v17 = vld [vmem:[%s3507_s29 + $0x70] sm:$0xff] }
  0x1d   : > { %v161_v18 = vld [vmem:[%s3507_s29 + $0x78] sm:$0xff]  ;;  %v162_v19 = vld [vmem:[%s3507_s29 + $0x80] sm:$0xff]  ;;  %v163_v20 = vld [vmem:[%s3507_s29 + $0x88] sm:$0xff] }
  0x1e   : > { %3053 = vmatmul.mubr.msk.f32.gmra.mrb[2].mxu0 %vm200_vm3, %v149_v6  ;;  %v164_v21 = vld [vmem:[%s3507_s29 + $0x90] sm:$0xff]  ;;  %v165_v22 = vld [vmem:[%s3507_s29 + $0x98] sm:$0xff]  ;;  %v166_v23 = vld [vmem:[%s3507_s29 + $0xa0] sm:$0xff] }
  0x1f   : > { %3055 = vmatprep.mubr.msk.f32.mxu0 %vm200_vm3, %v150_v7  ;;  %v167_v24 = vld [vmem:[%s3507_s29 + $0xa8] sm:$0xff]  ;;  %v168_v25 = vld [vmem:[%s3507_s29 + $0xb0] sm:$0xff]  ;;  %v169_v26 = vld [vmem:[%s3507_s29 + $0xb8] sm:$0xff] }
  0x20   : > { %v170_v27 = vld [vmem:[%s3507_s29 + $0xc0] sm:$0xff]  ;;  %v171_v28 = vld [vmem:[%s3507_s29 + $0xc8] sm:$0xff]  ;;  %v172_v29 = vld [vmem:[%s3507_s29 + $0xd0] sm:$0xff] }
  0x21   : > { %v173_v30 = vld [vmem:[%s3507_s29 + $0xd8] sm:$0xff]  ;;  %v174_v31 = vld [vmem:[%s3507_s29 + $0xe0] sm:$0xff]  ;;  %v175_v32 = vld [vmem:[%s3507_s29 + $0xe8] sm:$0xff] }
  0x22   : > { %3056 = vmatmul.mubr.msk.f32.gmra.mrb[4].mxu0 %vm200_vm3, %v151_v8  ;;  %v176_v33 = vld [vmem:[%s3507_s29 + $0xf0] sm:$0xff]  ;;  %v177_v34 = vld [vmem:[%s3507_s29 + $0xf8] sm:$0xff]  ;;  %v178_v35 = vld [vmem:[%s3507_s29 + $0x100] sm:$0xff] }
  0x23   : > { %3058 = vmatprep.mubr.msk.f32.mxu0 %vm200_vm3, %v152_v9  ;;  %v179_v36 = vld [vmem:[%s3507_s29 + $0x108] sm:$0xff]  ;;  %v180_v37 = vld [vmem:[%s3507_s29 + $0x110] sm:$0xff]  ;;  %v181_v38 = vld [vmem:[%s3507_s29 + $0x118] sm:$0xff] }
  0x24   : > { %v182_v39 = vld [vmem:[%s3507_s29 + $0x120] sm:$0xff]  ;;  %v183_v40 = vld [vmem:[%s3507_s29 + $0x128] sm:$0xff]  ;;  %v184_v41 = vld [vmem:[%s3507_s29 + $0x130] sm:$0xff] }
  0x25   : > { %v185_v42 = vld [vmem:[%s3507_s29 + $0x138] sm:$0xff]  ;;  %v186_v43 = vld [vmem:[%s3507_s29 + $0x140] sm:$0xff]  ;;  %v187_v44 = vld [vmem:[%s3507_s29 + $0x148] sm:$0xff] }
  0x26   : > { %3059 = vmatmul.mubr.msk.f32.gmra.mrb[6].mxu0 %vm200_vm3, %v153_v10  ;;  %v188_v45 = vld [vmem:[%s3507_s29 + $0x150] sm:$0xff]  ;;  %v189_v46 = vld [vmem:[%s3507_s29 + $0x158] sm:$0xff]  ;;  %v190_v47 = vld [vmem:[%s3507_s29 + $0x160] sm:$0xff] }
  0x27   : > { %3061 = vmatprep.mubr.msk.f32.mxu0 %vm200_vm3, %v154_v11  ;;  %3115 = vmatprep.mubr.msk.f32.mxu1 %vm200_vm3, %v190_v47  ;;  %v191_v48 = vld [vmem:[%s3507_s29 + $0x168] sm:$0xff]  ;;  %v192_v49 = vld [vmem:[%s3507_s29 + $0x170] sm:$0xff]  ;;  %v193_v50 = vld [vmem:[%s3507_s29 + $0x178] sm:$0xff] }
  0x28   : > { %3116 = vmatmul.mubr.msk.f32.vlgmr.msra.gmra.mrb[0].mxu1 %vm200_vm3, %v191_v48  ;;  %v194_v51 = vld [vmem:[%s3507_s29 + $0x180] sm:$0xff]  ;;  %v195_v52 = vld [vmem:[%s3507_s29 + $0x188] sm:$0xff] }
  0x29   : > { %3118 = vmatprep.mubr.msk.f32.mxu1 %vm200_vm3, %v192_v49 }
  0x2a   : > { %3062 = vmatmul.mubr.msk.f32.gmra.mrb[8].mxu0 %vm200_vm3, %v155_v12 }
  0x2b   : > { %3064 = vmatprep.mubr.msk.f32.mxu0 %vm200_vm3, %v156_v13 }
  0x2c   : > { %3119 = vmatmul.mubr.msk.f32.gmra.mrb[2].mxu1 %vm200_vm3, %v193_v50 }
  0x2d   : > { %3121 = vmatprep.mubr.msk.f32.mxu1 %vm200_vm3, %v194_v51 }
  0x2e   : > { %3065 = vmatmul.mubr.msk.f32.gmra.mrb[10].mxu0 %vm200_vm3, %v157_v14 }
  0x2f   : > { %3067 = vmatprep.mubr.msk.f32.mxu0 %vm200_vm3, %v158_v15 }
  0x30   : > { %3122 = vmatmul.mubr.msk.f32.gmra.mrb[4].mxu1 %vm200_vm3, %v195_v52 }
  0x32   : > { %3068 = vmatmul.mubr.msk.f32.gmra.mrb[12].mxu0 %vm200_vm3, %v159_v16 }
  0x33   : > { %3070 = vmatprep.mubr.msk.f32.mxu0 %vm200_vm3, %v160_v17 }
  0x36   : > { %3071 = vmatmul.mubr.msk.f32.gmra.mrb[14].mxu0 %vm200_vm3, %v161_v18 }
  0x37   : > { %3073 = vmatprep.mubr.msk.f32.mxu0 %vm200_vm3, %v162_v19 }
  0x3a   : > { %3074 = vmatmul.mubr.msk.f32.gmra.mrb[16].mxu0 %vm200_vm3, %v163_v20 }
  0x3b   : > { %3076 = vmatprep.mubr.msk.f32.mxu0 %vm200_vm3, %v164_v21 }
  0x3e   : > { %3077 = vmatmul.mubr.msk.f32.gmra.mrb[18].mxu0 %vm200_vm3, %v165_v22 }
  0x3f   : > { %3079 = vmatprep.mubr.msk.f32.mxu0 %vm200_vm3, %v166_v23 }
  0x42   : > { %3080 = vmatmul.mubr.msk.f32.gmra.mrb[20].mxu0 %vm200_vm3, %v167_v24 }
  0x43   : > { %3082 = vmatprep.mubr.msk.f32.mxu0 %vm200_vm3, %v168_v25 }
  0x46   : > { %3083 = vmatmul.mubr.msk.f32.gmra.mrb[22].mxu0 %vm200_vm3, %v169_v26 }
  0x47   : > { %3085 = vmatprep.mubr.msk.f32.mxu0 %vm200_vm3, %v170_v27 }
  0x4a   : > { %3086 = vmatmul.mubr.msk.f32.gmra.mrb[24].mxu0 %vm200_vm3, %v171_v28 }
  0x4b   : > { %3088 = vmatprep.mubr.msk.f32.mxu0 %vm200_vm3, %v172_v29 }
  0x4e   : > { %3089 = vmatmul.mubr.msk.f32.gmra.mrb[26].mxu0 %vm200_vm3, %v173_v30 }
  0x4f   : > { %3091 = vmatprep.mubr.msk.f32.mxu0 %vm200_vm3, %v174_v31 }
  0x52   : > { %3092 = vmatmul.mubr.msk.f32.gmra.mrb[28].mxu0 %vm200_vm3, %v175_v32 }
  0x53   : > { %3094 = vmatprep.mubr.msk.f32.mxu0 %vm200_vm3, %v176_v33 }
  0x56   : > { %3095 = vmatmul.mubr.msk.f32.gmra.mrb[30].mxu0 %vm200_vm3, %v177_v34 }
  0x57   : > { %3097 = vmatprep.mubr.msk.f32.mxu0 %vm200_vm3, %v178_v35 }
  0x5a   : > { %3098 = vmatmul.mubr.msk.f32.gmra.mrb[32].mxu0 %vm200_vm3, %v179_v36 }
  0x5b   : > { %3100 = vmatprep.mubr.msk.f32.mxu0 %vm200_vm3, %v180_v37 }
  0x5e   : > { %3101 = vmatmul.mubr.msk.f32.gmra.mrb[34].mxu0 %vm200_vm3, %v181_v38 }
  0x5f   : > { %3103 = vmatprep.mubr.msk.f32.mxu0 %vm200_vm3, %v182_v39 }
  0x62   : > { %3104 = vmatmul.mubr.msk.f32.gmra.mrb[36].mxu0 %vm200_vm3, %v183_v40 }
  0x63   : > { %3106 = vmatprep.mubr.msk.f32.mxu0 %vm200_vm3, %v184_v41 }
  0x66   : > { %3107 = vmatmul.mubr.msk.f32.gmra.mrb[38].mxu0 %vm200_vm3, %v185_v42 }
  0x67   : > { %3109 = vmatprep.mubr.msk.f32.mxu0 %vm200_vm3, %v186_v43 }
  0x6a   : > { %3110 = vmatmul.mubr.msk.f32.gmra.mrb[40].mxu0 %vm200_vm3, %v187_v44 }
  0x6b   : > { %3112 = vmatprep.mubr.msk.f32.mxu0 %vm200_vm3, %v188_v45 }
  0x6e   : > { %3113 = vmatmul.mubr.msk.f32.gmra.mrb[42].mxu0 %vm200_vm3, %v189_v46  ;;  %vm2518_vm3 = vcmask 687104  }
  0xed   : > { %v3051_v54 = vpop.f32.mrb[0].mxu0 }
  0xee   : > { %v427_v55 = vadd.f32 %v3051_v54, %v3612_v53  ;;  %v421_v56 = vpop.f32.mrb[1].mxu0 }
  0xef   : > { %v422_v57 = vadd.f32 %v3612_v53, %v421_v56 }
  0xf0   : > { %672 = vst.msk [vmem:[#allocation2 + $0x8] sm:$0xff] %vm670_vm4, %v427_v55 }
  0xf1   : > { %671 = vst.msk [vmem:[#allocation2] sm:$0xff] %vm670_vm4, %v422_v57  ;;  %v3054_v58 = vpop.f32.mrb[2].mxu0 }
  0xf2   : > { %v437_v59 = vadd.f32 %v3054_v58, %v3612_v53  ;;  %v431_v60 = vpop.f32.mrb[3].mxu0 }
  0xf3   : > { %v432_v61 = vadd.f32 %v3612_v53, %v431_v60 }
  0xf4   : > { %674 = vst.msk [vmem:[#allocation2 + $0x18] sm:$0xff] %vm670_vm4, %v437_v59 }
  0xf5   : > { %673 = vst.msk [vmem:[#allocation2 + $0x10] sm:$0xff] %vm670_vm4, %v432_v61  ;;  %v3057_v62 = vpop.f32.mrb[4].mxu0 }
  0xf6   : > { %v447_v63 = vadd.f32 %v3057_v62, %v3612_v53  ;;  %v441_v0 = vpop.f32.mrb[5].mxu0 }
  0xf7   : > { %v442_v1 = vadd.f32 %v3612_v53, %v441_v0  ;;  %v722_v17 = vld [vmem:[#allocation2 + $0x8] sm:$0xff] }
  0xf8   : > { %676 = vst.msk [vmem:[#allocation2 + $0x28] sm:$0xff] %vm670_vm4, %v447_v63  ;;  %v721_v5 = vld [vmem:[#allocation2] sm:$0xff] }
  0xf9   : > { %675 = vst.msk [vmem:[#allocation2 + $0x20] sm:$0xff] %vm670_vm4, %v442_v1  ;;  %v3060_v2 = vpop.f32.mrb[6].mxu0  ;;  %v768_v6 = vld [vmem:[#allocation2 + $0x1] sm:$0xff] }
  0xfa   : > { %v457_v3 = vadd.f32 %v3060_v2, %v3612_v53  ;;  %v451_v4 = vpop.f32.mrb[7].mxu0  ;;  %v815_v11 = vmax.f32 %v721_v5, %v768_v6 }
  0xfb   : > { %v452_v7 = vadd.f32 %v3612_v53, %v451_v4  ;;  %v724_v35 = vld [vmem:[#allocation2 + $0x18] sm:$0xff] }
  0xfc   : > { %678 = vst.msk [vmem:[#allocation2 + $0x38] sm:$0xff] %vm670_vm4, %v457_v3  ;;  %v862_v8 = vld [vmem:[#allocation2 + $0x14] sm:$0xff]  ;;  %v769_v15 = vld [vmem:[#allocation2 + $0x9] sm:$0xff] }
  0xfd   : > { %v909_v9 = vld [vmem:[#allocation2 + $0x15] sm:$0xff]  ;;  %677 = vst.msk [vmem:[#allocation2 + $0x30] sm:$0xff] %vm670_vm4, %v452_v7  ;;  %v3063_v10 = vpop.f32.mrb[8].mxu0  ;;  %v816_v25 = vmax.f32 %v722_v17, %v769_v15 }
  0xfe   : > { %v956_v12 = vmax.f32 %v862_v8, %v909_v9  ;;  %v467_v13 = vadd.f32 %v3063_v10, %v3612_v53  ;;  %v461_v14 = vpop.f32.mrb[9].mxu0  ;;  %v723_v18 = vld [vmem:[#allocation2 + $0x10] sm:$0xff] }
  0xff   : > { %v462_v16 = vadd.f32 %v3612_v53, %v461_v14  ;;  %v770_v19 = vld [vmem:[#allocation2 + $0x11] sm:$0xff]  ;;  %v726_v56 = vld [vmem:[#allocation2 + $0x28] sm:$0xff] }
 0x100   : > { %680 = vst.msk [vmem:[#allocation2 + $0x48] sm:$0xff] %vm670_vm4, %v467_v13  ;;  %v1003_v20 = vmax.f32 %v815_v11, %v956_v12  ;;  %v863_v21 = vld [vmem:[#allocation2 + $0x1c] sm:$0xff]  ;;  %v864_v22 = vld [vmem:[#allocation2 + $0x24] sm:$0xff]  ;;  %v817_v31 = vmax.f32 %v723_v18, %v770_v19 }
 0x101   : > { %v910_v23 = vld [vmem:[#allocation2 + $0x1d] sm:$0xff]  ;;  %679 = vst.msk [vmem:[#allocation2 + $0x40] sm:$0xff] %vm670_vm4, %v462_v16  ;;  %v3066_v24 = vpop.f32.mrb[10].mxu0  ;;  %v911_v26 = vld [vmem:[#allocation2 + $0x25] sm:$0xff] }
 0x102   : > { %v957_v27 = vmax.f32 %v863_v21, %v910_v23  ;;  %v477_v28 = vadd.f32 %v3066_v24, %v3612_v53  ;;  %v471_v29 = vpop.f32.mrb[11].mxu0  ;;  %v1050_v30 = vmax.f32 %v1003_v20, 0.0  ;;  %v771_v32 = vld [vmem:[#allocation2 + $0x19] sm:$0xff]  ;;  %v958_v33 = vmax.f32 %v864_v22, %v911_v26  ;;  %v772_v37 = vld [vmem:[#allocation2 + $0x21] sm:$0xff] }
 0x103   : > { %v472_v34 = vadd.f32 %v3612_v53, %v471_v29  ;;  %v725_v36 = vld [vmem:[#allocation2 + $0x20] sm:$0xff]  ;;  %v818_v44 = vmax.f32 %v724_v35, %v771_v32  ;;  %v728_v12 = vld [vmem:[#allocation2 + $0x38] sm:$0xff] }
 0x104   : > { %682 = vst.msk [vmem:[#allocation2 + $0x58] sm:$0xff] %vm670_vm4, %v477_v28  ;;  %v1004_v38 = vmax.f32 %v816_v25, %v957_v27  ;;  %1097 = vst.msk [vmem:[#allocation3] sm:$0xff] %vm670_vm4, %v1050_v30  ;;  %v865_v39 = vld [vmem:[#allocation2 + $0x2c] sm:$0xff]  ;;  %v866_v40 = vld [vmem:[#allocation2 + $0x34] sm:$0xff]  ;;  %v1005_v43 = vmax.f32 %v817_v31, %v958_v33  ;;  %v819_v50 = vmax.f32 %v725_v36, %v772_v37 }
 0x105   : > { %v912_v41 = vld [vmem:[#allocation2 + $0x2d] sm:$0xff]  ;;  %681 = vst.msk [vmem:[#allocation2 + $0x50] sm:$0xff] %vm670_vm4, %v472_v34  ;;  %v3069_v42 = vpop.f32.mrb[12].mxu0  ;;  %v913_v45 = vld [vmem:[#allocation2 + $0x35] sm:$0xff] }
 0x106   : > { %v959_v46 = vmax.f32 %v865_v39, %v912_v41  ;;  %v487_v47 = vadd.f32 %v3069_v42, %v3612_v53  ;;  %v481_v48 = vpop.f32.mrb[13].mxu0  ;;  %v1051_v49 = vmax.f32 %v1004_v38, 0.0  ;;  %v773_v51 = vld [vmem:[#allocation2 + $0x29] sm:$0xff]  ;;  %v960_v52 = vmax.f32 %v866_v40, %v913_v45  ;;  %v774_v58 = vld [vmem:[#allocation2 + $0x31] sm:$0xff] }
 0x107   : > { %v482_v54 = vadd.f32 %v3612_v53, %v481_v48  ;;  %v1052_v55 = vmax.f32 %v1005_v43, 0.0  ;;  %v727_v57 = vld [vmem:[#allocation2 + $0x30] sm:$0xff]  ;;  %v820_v1 = vmax.f32 %v726_v56, %v773_v51  ;;  %v730_v34 = vld [vmem:[#allocation2 + $0x48] sm:$0xff] }
 0x108   : > { %684 = vst.msk [vmem:[#allocation2 + $0x68] sm:$0xff] %vm670_vm4, %v487_v47  ;;  %1098 = vst.msk [vmem:[#allocation3 + $0x8] sm:$0xff] %vm670_vm4, %v1051_v49  ;;  %v1006_v59 = vmax.f32 %v818_v44, %v959_v46  ;;  %v867_v60 = vld [vmem:[#allocation2 + $0x3c] sm:$0xff]  ;;  %v868_v61 = vld [vmem:[#allocation2 + $0x44] sm:$0xff]  ;;  %v1007_v0 = vmax.f32 %v819_v50, %v960_v52  ;;  %v821_v7 = vmax.f32 %v727_v57, %v774_v58 }
 0x109   : > { %v914_v62 = vld [vmem:[#allocation2 + $0x3d] sm:$0xff]  ;;  %683 = vst.msk [vmem:[#allocation2 + $0x60] sm:$0xff] %vm670_vm4, %v482_v54  ;;  %v3072_v63 = vpop.f32.mrb[14].mxu0  ;;  %1099 = vst.msk [vmem:[#allocation3 + $0x10] sm:$0xff] %vm670_vm4, %v1052_v55  ;;  %v915_v2 = vld [vmem:[#allocation2 + $0x45] sm:$0xff] }
 0x10a   : > { %v961_v3 = vmax.f32 %v867_v60, %v914_v62  ;;  %v497_v4 = vadd.f32 %v3072_v63, %v3612_v53  ;;  %v491_v5 = vpop.f32.mrb[15].mxu0  ;;  %v1053_v6 = vmax.f32 %v1006_v59, 0.0  ;;  %v775_v8 = vld [vmem:[#allocation2 + $0x39] sm:$0xff]  ;;  %v962_v9 = vmax.f32 %v868_v61, %v915_v2  ;;  %v776_v14 = vld [vmem:[#allocation2 + $0x41] sm:$0xff] }
 0x10b   : > { %v492_v10 = vadd.f32 %v3612_v53, %v491_v5  ;;  %v1054_v11 = vmax.f32 %v1007_v0, 0.0  ;;  %v729_v13 = vld [vmem:[#allocation2 + $0x40] sm:$0xff]  ;;  %v822_v21 = vmax.f32 %v728_v12, %v775_v8  ;;  %v732_v51 = vld [vmem:[#allocation2 + $0x58] sm:$0xff] }
 0x10c   : > { %686 = vst.msk [vmem:[#allocation2 + $0x78] sm:$0xff] %vm670_vm4, %v497_v4  ;;  %1100 = vst.msk [vmem:[#allocation3 + $0x18] sm:$0xff] %vm670_vm4, %v1053_v6  ;;  %v1008_v15 = vmax.f32 %v820_v1, %v961_v3  ;;  %v869_v16 = vld [vmem:[#allocation2 + $0x4c] sm:$0xff]  ;;  %v870_v17 = vld [vmem:[#allocation2 + $0x54] sm:$0xff]  ;;  %v1009_v20 = vmax.f32 %v821_v7, %v962_v9  ;;  %v823_v27 = vmax.f32 %v729_v13, %v776_v14 }
 0x10d   : > { %v916_v18 = vld [vmem:[#allocation2 + $0x4d] sm:$0xff]  ;;  %685 = vst.msk [vmem:[#allocation2 + $0x70] sm:$0xff] %vm670_vm4, %v492_v10  ;;  %v3075_v19 = vpop.f32.mrb[16].mxu0  ;;  %1101 = vst.msk [vmem:[#allocation3 + $0x20] sm:$0xff] %vm670_vm4, %v1054_v11  ;;  %v917_v22 = vld [vmem:[#allocation2 + $0x55] sm:$0xff] }
 0x10e   : > { %v963_v23 = vmax.f32 %v869_v16, %v916_v18  ;;  %v507_v24 = vadd.f32 %v3075_v19, %v3612_v53  ;;  %v501_v25 = vpop.f32.mrb[17].mxu0  ;;  %v1055_v26 = vmax.f32 %v1008_v15, 0.0  ;;  %v731_v28 = vld [vmem:[#allocation2 + $0x50] sm:$0xff]  ;;  %v964_v31 = vmax.f32 %v870_v17, %v917_v22 }
 0x10f   : > { %v777_v29 = vld [vmem:[#allocation2 + $0x49] sm:$0xff]  ;;  %v778_v30 = vld [vmem:[#allocation2 + $0x51] sm:$0xff]  ;;  %v502_v32 = vadd.f32 %v3612_v53, %v501_v25  ;;  %v1056_v33 = vmax.f32 %v1009_v20, 0.0 }
 0x110   : > { %v3653_v35 = vld [vmem:[#allocation2 + $0x60] sm:$0xff]  ;;  %688 = vst.msk [vmem:[#allocation2 + $0x88] sm:$0xff] %vm670_vm4, %v507_v24  ;;  %1102 = vst.msk [vmem:[#allocation3 + $0x28] sm:$0xff] %vm670_vm4, %v1055_v26  ;;  %v1010_v37 = vmax.f32 %v822_v21, %v963_v23  ;;  %v1011_v42 = vmax.f32 %v823_v27, %v964_v31  ;;  %v824_v43 = vmax.f32 %v730_v34, %v777_v29  ;;  %v3662_v52 = vld [vmem:[#allocation2 + $0x68] sm:$0xff] }
 0x111   : > { %v3655_v36 = vld [vmem:[#allocation2 + $0x61] sm:$0xff]  ;;  %687 = vst.msk [vmem:[#allocation2 + $0x80] sm:$0xff] %vm670_vm4, %v502_v32  ;;  %v3078_v41 = vpop.f32.mrb[18].mxu0  ;;  %1103 = vst.msk [vmem:[#allocation3 + $0x30] sm:$0xff] %vm670_vm4, %v1056_v33  ;;  %v825_v44 = vmax.f32 %v731_v28, %v778_v30  ;;  %v1180_v48 = vld [vmem:[#allocation3 + $0x2] ss:$2 sm:$0xff] }
 0x112   : > { %v871_v38 = vld [vmem:[#allocation2 + $0x5c] sm:$0xff]  ;;  %v872_v39 = vld [vmem:[#allocation2 + $0x64] sm:$0xff]  ;;  %v517_v49 = vadd.f32 %v3078_v41, %v3612_v53  ;;  %v511_v50 = vpop.f32.mrb[19].mxu0  ;;  %1407 = vrot.lane.b32.xlu0 %v1180_v48, %s3418_s5  ;;  %v1057_v57 = vmax.f32 %v1010_v37, 0.0  ;;  %v1058_v58 = vmax.f32 %v1011_v42, 0.0  ;;  %v827_v63 = vmax.f32 %v3653_v35, %v3655_v36 }
 0x113   : > { %v918_v40 = vld [vmem:[#allocation2 + $0x5d] sm:$0xff]  ;;  %v919_v45 = vld [vmem:[#allocation2 + $0x65] sm:$0xff]  ;;  %v512_v56 = vadd.f32 %v3612_v53, %v511_v50 }
 0x114   : > { %v965_v46 = vmax.f32 %v871_v38, %v918_v40  ;;  %v1216_v47 = vld [vmem:[#allocation3 + $0x4] ss:$2 sm:$0xff]  ;;  %v966_v55 = vmax.f32 %v872_v39, %v919_v45  ;;  %v781_v60 = vld [vmem:[#allocation2 + $0x69] sm:$0xff]  ;;  %690 = vst.msk [vmem:[#allocation2 + $0x98] sm:$0xff] %vm670_vm4, %v517_v49  ;;  %1104 = vst.msk [vmem:[#allocation3 + $0x38] sm:$0xff] %vm670_vm4, %v1057_v57 }
 0x115   : > { %v779_v54 = vld [vmem:[#allocation2 + $0x59] sm:$0xff]  ;;  %1479 = vrot.lane.b32.xlu1 %v1216_v47, %s3417_s4  ;;  %v3667_v59 = vld [vmem:[#allocation2 + $0x70] sm:$0xff]  ;;  %689 = vst.msk [vmem:[#allocation2 + $0x90] sm:$0xff] %vm670_vm4, %v512_v56  ;;  %v3081_v3 = vpop.f32.mrb[20].mxu0  ;;  %1105 = vst.msk [vmem:[#allocation3 + $0x40] sm:$0xff] %vm670_vm4, %v1058_v58  ;;  %v828_v17 = vmax.f32 %v3662_v52, %v781_v60 }
 0x116   : > { %v3669_v61 = vld [vmem:[#allocation2 + $0x71] sm:$0xff]  ;;  %v1012_v62 = vmax.f32 %v824_v43, %v965_v46  ;;  %v1013_v4 = vmax.f32 %v825_v44, %v966_v55  ;;  %v826_v5 = vmax.f32 %v732_v51, %v779_v54  ;;  %v1182_v9 = vld [vmem:[#allocation3 + $0x12] ss:$2 sm:$0xff]  ;;  %v527_v10 = vadd.f32 %v3081_v3, %v3612_v53  ;;  %v521_v11 = vpop.f32.mrb[21].mxu0 }
 0x117   : > { %v873_v0 = vld [vmem:[#allocation2 + $0x6c] sm:$0xff]  ;;  %v874_v1 = vld [vmem:[#allocation2 + $0x74] sm:$0xff]  ;;  %1409 = vrot.lane.b32.xlu0 %v1182_v9, %s3418_s5  ;;  %v522_v14 = vadd.f32 %v3612_v53, %v521_v11  ;;  %v829_v22 = vmax.f32 %v3667_v59, %v3669_v61 }
 0x118   : > { %v920_v2 = vld [vmem:[#allocation2 + $0x6d] sm:$0xff]  ;;  %v921_v6 = vld [vmem:[#allocation2 + $0x75] sm:$0xff]  ;;  %v1059_v15 = vmax.f32 %v1012_v62, 0.0  ;;  %v1060_v16 = vmax.f32 %v1013_v4, 0.0  ;;  %v3684_v18 = vld [vmem:[#allocation2 + $0x80] sm:$0xff]  ;;  %692 = vst.msk [vmem:[#allocation2 + $0xa8] sm:$0xff] %vm670_vm4, %v527_v10 }
 0x119   : > { %v967_v7 = vmax.f32 %v873_v0, %v920_v2  ;;  %v1218_v8 = vld [vmem:[#allocation3 + $0x14] ss:$2 sm:$0xff]  ;;  %v3678_v12 = vld [vmem:[#allocation2 + $0x78] sm:$0xff]  ;;  %v968_v13 = vmax.f32 %v874_v1, %v921_v6  ;;  %691 = vst.msk [vmem:[#allocation2 + $0xa0] sm:$0xff] %vm670_vm4, %v522_v14  ;;  %v3084_v26 = vpop.f32.mrb[22].mxu0 }
 0x11a   : > { %1481 = vrot.lane.b32.xlu1 %v1218_v8, %s3417_s4  ;;  %v783_v19 = vld [vmem:[#allocation2 + $0x79] sm:$0xff]  ;;  %v3686_v20 = vld [vmem:[#allocation2 + $0x81] sm:$0xff]  ;;  %1106 = vst.msk [vmem:[#allocation3 + $0x48] sm:$0xff] %vm670_vm4, %v1059_v15  ;;  %1107 = vst.msk [vmem:[#allocation3 + $0x50] sm:$0xff] %vm670_vm4, %v1060_v16  ;;  %v537_v32 = vadd.f32 %v3084_v26, %v3612_v53  ;;  %v531_v33 = vpop.f32.mrb[23].mxu0 }
 0x11b   : > { %v1014_v21 = vmax.f32 %v826_v5, %v967_v7  ;;  %v875_v23 = vld [vmem:[#allocation2 + $0x7c] sm:$0xff]  ;;  %v876_v24 = vld [vmem:[#allocation2 + $0x84] sm:$0xff]  ;;  %v1015_v27 = vmax.f32 %v827_v63, %v968_v13  ;;  %v532_v36 = vadd.f32 %v3612_v53, %v531_v33  ;;  %v830_v39 = vmax.f32 %v3678_v12, %v783_v19 }
 0x11c   : > { %v922_v25 = vld [vmem:[#allocation2 + $0x7d] sm:$0xff]  ;;  %v923_v28 = vld [vmem:[#allocation2 + $0x85] sm:$0xff]  ;;  %v3701_v40 = vld [vmem:[#allocation2 + $0x90] sm:$0xff]  ;;  %694 = vst.msk [vmem:[#allocation2 + $0xb8] sm:$0xff] %vm670_vm4, %v537_v32  ;;  %v831_v44 = vmax.f32 %v3684_v18, %v3686_v20 }
 0x11d   : > { %v969_v29 = vmax.f32 %v875_v23, %v922_v25  ;;  %v1184_v30 = vld [vmem:[#allocation3 + $0x22] ss:$2 sm:$0xff]  ;;  %v3695_v34 = vld [vmem:[#allocation2 + $0x88] sm:$0xff]  ;;  %v970_v35 = vmax.f32 %v876_v24, %v923_v28  ;;  %v1061_v37 = vmax.f32 %v1014_v21, 0.0  ;;  %v1062_v38 = vmax.f32 %v1015_v27, 0.0  ;;  %693 = vst.msk [vmem:[#allocation2 + $0xb0] sm:$0xff] %vm670_vm4, %v532_v36 }
 0x11e   : > { %v1252_v31 = vld [vmem:[#allocation3 + $0x28] ss:$2 sm:$0xff]  ;;  %1411 = vrot.lane.b32.xlu1 %v1184_v30, %s3418_s5  ;;  %v785_v41 = vld [vmem:[#allocation2 + $0x89] sm:$0xff]  ;;  %v3087_v48 = vpop.f32.mrb[24].mxu0 }
 0x11f   : > { %1551 = vrot.lane.b32.xlu0 %v1252_v31, %s3419_s6  ;;  %v1220_v42 = vld [vmem:[#allocation3 + $0x24] ss:$2 sm:$0xff]  ;;  %v1016_v43 = vmax.f32 %v828_v17, %v969_v29  ;;  %v877_v45 = vld [vmem:[#allocation2 + $0x8c] sm:$0xff]  ;;  %1108 = vst.msk [vmem:[#allocation3 + $0x58] sm:$0xff] %vm670_vm4, %v1061_v37  ;;  %1109 = vst.msk [vmem:[#allocation3 + $0x60] sm:$0xff] %vm670_vm4, %v1062_v38  ;;  %v1017_v49 = vmax.f32 %v829_v22, %v970_v35  ;;  %v547_v55 = vadd.f32 %v3087_v48, %v3612_v53  ;;  %v541_v56 = vpop.f32.mrb[25].mxu0 }
 0x120   : > { %v878_v46 = vld [vmem:[#allocation2 + $0x94] sm:$0xff]  ;;  %v542_v59 = vadd.f32 %v3612_v53, %v541_v56  ;;  %v832_v61 = vmax.f32 %v3695_v34, %v785_v41  ;;  %v1186_v0 = vld [vmem:[#allocation3 + $0x32] ss:$2 sm:$0xff] }
 0x121   : > { %v924_v47 = vld [vmem:[#allocation2 + $0x8d] sm:$0xff]  ;;  %v925_v51 = vld [vmem:[#allocation2 + $0x95] sm:$0xff]  ;;  %v1063_v60 = vmax.f32 %v1016_v43, 0.0  ;;  %696 = vst.msk [vmem:[#allocation2 + $0xc8] sm:$0xff] %vm670_vm4, %v547_v55  ;;  %v1064_v1 = vmax.f32 %v1017_v49, 0.0  ;;  %v880_v5 = vld [vmem:[#allocation2 + $0xa4] sm:$0xff] }
 0x122   : > { %v786_v50 = vld [vmem:[#allocation2 + $0x91] sm:$0xff]  ;;  %v971_v52 = vmax.f32 %v877_v45, %v924_v47  ;;  %v1288_v54 = vld [vmem:[#allocation3 + $0x2a] ss:$2 sm:$0xff]  ;;  %v972_v58 = vmax.f32 %v878_v46, %v925_v51  ;;  %1483 = vrot.lane.b32.xlu1 %v1220_v42, %s3417_s4  ;;  %695 = vst.msk [vmem:[#allocation2 + $0xc0] sm:$0xff] %vm670_vm4, %v542_v59  ;;  %v3090_v7 = vpop.f32.mrb[26].mxu0 }
 0x123   : > { %v3710_v57 = vld [vmem:[#allocation2 + $0x98] sm:$0xff]  ;;  %1623 = vrot.lane.b32.xlu0 %v1288_v54, %s3420_s7  ;;  %v1254_v63 = vld [vmem:[#allocation3 + $0x38] ss:$2 sm:$0xff]  ;;  %v833_v3 = vmax.f32 %v3701_v40, %v786_v50  ;;  %1110 = vst.msk [vmem:[#allocation3 + $0x68] sm:$0xff] %vm670_vm4, %v1063_v60  ;;  %v741_v9 = vld [vmem:[#allocation2 + $0xa0] sm:$0xff]  ;;  %v557_v13 = vadd.f32 %v3090_v7, %v3612_v53  ;;  %v551_v14 = vpop.f32.mrb[27].mxu0 }
 0x124   : > { %v787_v62 = vld [vmem:[#allocation2 + $0x99] sm:$0xff]  ;;  %v1018_v2 = vmax.f32 %v830_v39, %v971_v52  ;;  %v1019_v8 = vmax.f32 %v831_v44, %v972_v58  ;;  %v788_v10 = vld [vmem:[#allocation2 + $0xa1] sm:$0xff]  ;;  %1111 = vst.msk [vmem:[#allocation3 + $0x70] sm:$0xff] %vm670_vm4, %v1064_v1  ;;  %v552_v16 = vadd.f32 %v3612_v53, %v551_v14  ;;  %v3728_v22 = vld [vmem:[#allocation2 + $0xb0] sm:$0xff] }
 0x125   : > { %v879_v4 = vld [vmem:[#allocation2 + $0x9c] sm:$0xff]  ;;  %v927_v11 = vld [vmem:[#allocation2 + $0xa5] sm:$0xff]  ;;  %v834_v19 = vmax.f32 %v3710_v57, %v787_v62  ;;  %698 = vst.msk [vmem:[#allocation2 + $0xd8] sm:$0xff] %vm670_vm4, %v557_v13  ;;  %v835_v25 = vmax.f32 %v741_v9, %v788_v10  ;;  %v882_v27 = vld [vmem:[#allocation2 + $0xb4] sm:$0xff]  ;;  %v3093_v29 = vpop.f32.mrb[28].mxu0 }
 0x126   : > { %v926_v6 = vld [vmem:[#allocation2 + $0x9d] sm:$0xff]  ;;  %v974_v15 = vmax.f32 %v880_v5, %v927_v11  ;;  %1553 = vrot.lane.b32.xlu1 %v1254_v63, %s3419_s6  ;;  %v1065_v17 = vmax.f32 %v1018_v2, 0.0  ;;  %v3725_v18 = vld [vmem:[#allocation2 + $0xa8] sm:$0xff]  ;;  %v1066_v23 = vmax.f32 %v1019_v8, 0.0  ;;  %697 = vst.msk [vmem:[#allocation2 + $0xd0] sm:$0xff] %vm670_vm4, %v552_v16  ;;  %v790_v32 = vld [vmem:[#allocation2 + $0xb1] sm:$0xff]  ;;  %v567_v35 = vadd.f32 %v3093_v29, %v3612_v53 }
 0x127   : > { %v973_v12 = vmax.f32 %v879_v4, %v926_v6  ;;  %1413 = vrot.lane.b32.xlu0 %v1186_v0, %s3418_s5  ;;  %v1324_v20 = vld [vmem:[#allocation3 + $0x2c] ss:$2 sm:$0xff]  ;;  %v881_v26 = vld [vmem:[#allocation2 + $0xac] sm:$0xff]  ;;  %v561_v36 = vpop.f32.mrb[29].mxu0  ;;  %v837_v45 = vmax.f32 %v3728_v22, %v790_v32 }
 0x128   : > { %v1222_v21 = vld [vmem:[#allocation3 + $0x34] ss:$2 sm:$0xff]  ;;  %1112 = vst.msk [vmem:[#allocation3 + $0x78] sm:$0xff] %vm670_vm4, %v1065_v17  ;;  %v1021_v30 = vmax.f32 %v833_v3, %v974_v15  ;;  %v929_v33 = vld [vmem:[#allocation2 + $0xb5] sm:$0xff]  ;;  %1113 = vst.msk [vmem:[#allocation3 + $0x80] sm:$0xff] %vm670_vm4, %v1066_v23  ;;  %v562_v38 = vadd.f32 %v3612_v53, %v561_v36 }
 0x129   : > { %v1020_v24 = vmax.f32 %v832_v61, %v973_v12  ;;  %v928_v28 = vld [vmem:[#allocation2 + $0xad] sm:$0xff]  ;;  %v976_v37 = vmax.f32 %v882_v27, %v929_v33  ;;  %v3738_v39 = vld [vmem:[#allocation2 + $0xb8] sm:$0xff]  ;;  %700 = vst.msk [vmem:[#allocation2 + $0xe8] sm:$0xff] %vm670_vm4, %v567_v35  ;;  %v884_v48 = vld [vmem:[#allocation2 + $0xc4] sm:$0xff]  ;;  %v3096_v49 = vpop.f32.mrb[30].mxu0 }
 0x12a   : > { %v789_v31 = vld [vmem:[#allocation2 + $0xa9] sm:$0xff]  ;;  %v975_v34 = vmax.f32 %v881_v26, %v928_v28  ;;  %1695 = vrot.lane.b32.xlu1 %v1324_v20, %s3421_s8  ;;  %v1256_v40 = vld [vmem:[#allocation3 + $0x48] ss:$2 sm:$0xff]  ;;  %v1068_v42 = vmax.f32 %v1021_v30, 0.0  ;;  %699 = vst.msk [vmem:[#allocation2 + $0xe0] sm:$0xff] %vm670_vm4, %v562_v38  ;;  %v577_v55 = vadd.f32 %v3096_v49, %v3612_v53  ;;  %v571_v56 = vpop.f32.mrb[31].mxu0 }
 0x12b   : > { %1485 = vrot.lane.b32.xlu0 %v1222_v21, %s3417_s4  ;;  %v1067_v41 = vmax.f32 %v1020_v24, 0.0  ;;  %v836_v44 = vmax.f32 %v3725_v18, %v789_v31  ;;  %v1290_v46 = vld [vmem:[#allocation3 + $0x3a] ss:$2 sm:$0xff]  ;;  %v883_v47 = vld [vmem:[#allocation2 + $0xbc] sm:$0xff]  ;;  %v1023_v50 = vmax.f32 %v835_v25, %v976_v37  ;;  %v572_v62 = vadd.f32 %v3612_v53, %v571_v56 }
 0x12c   : > { %v1022_v43 = vmax.f32 %v834_v19, %v975_v34  ;;  %v791_v51 = vld [vmem:[#allocation2 + $0xb9] sm:$0xff]  ;;  %v931_v54 = vld [vmem:[#allocation2 + $0xc5] sm:$0xff]  ;;  %1115 = vst.msk [vmem:[#allocation3 + $0x90] sm:$0xff] %vm670_vm4, %v1068_v42  ;;  %702 = vst.msk [vmem:[#allocation2 + $0xf8] sm:$0xff] %vm670_vm4, %v577_v55 }
 0x12d   : > { %v930_v52 = vld [vmem:[#allocation2 + $0xbd] sm:$0xff]  ;;  %1114 = vst.msk [vmem:[#allocation3 + $0x88] sm:$0xff] %vm670_vm4, %v1067_v41  ;;  %v978_v61 = vmax.f32 %v884_v48, %v931_v54  ;;  %v1070_v0 = vmax.f32 %v1023_v50, 0.0  ;;  %v1326_v1 = vld [vmem:[#allocation3 + $0x3c] ss:$2 sm:$0xff]  ;;  %v838_v3 = vmax.f32 %v3738_v39, %v791_v51  ;;  %701 = vst.msk [vmem:[#allocation2 + $0xf0] sm:$0xff] %vm670_vm4, %v572_v62 }
 0x12e   : > { %v1069_v57 = vmax.f32 %v1022_v43, 0.0  ;;  %1555 = vrot.lane.b32.xlu1 %v1256_v40, %s3419_s6  ;;  %v745_v58 = vld [vmem:[#allocation2 + $0xc0] sm:$0xff]  ;;  %v977_v60 = vmax.f32 %v883_v47, %v930_v52  ;;  %v746_v2 = vld [vmem:[#allocation2 + $0xc8] sm:$0xff]  ;;  %v747_v4 = vld [vmem:[#allocation2 + $0xd0] sm:$0xff]  ;;  %v3099_v5 = vpop.f32.mrb[32].mxu0 }
 0x12f   : > { %1625 = vrot.lane.b32.xlu0 %v1290_v46, %s3420_s7  ;;  %v792_v59 = vld [vmem:[#allocation2 + $0xc1] sm:$0xff]  ;;  %v1025_v7 = vmax.f32 %v837_v45, %v978_v61  ;;  %v885_v9 = vld [vmem:[#allocation2 + $0xcc] sm:$0xff]  ;;  %v886_v10 = vld [vmem:[#allocation2 + $0xd4] sm:$0xff]  ;;  %1117 = vst.msk [vmem:[#allocation3 + $0xa0] sm:$0xff] %vm670_vm4, %v1070_v0  ;;  %v587_v12 = vadd.f32 %v3099_v5, %v3612_v53  ;;  %v581_v13 = vpop.f32.mrb[33].mxu0 }
 0x130   : > { %v1224_v63 = vld [vmem:[#allocation3 + $0x44] ss:$2 sm:$0xff]  ;;  %1116 = vst.msk [vmem:[#allocation3 + $0x98] sm:$0xff] %vm670_vm4, %v1069_v57  ;;  %v1024_v6 = vmax.f32 %v836_v44, %v977_v60  ;;  %v839_v8 = vmax.f32 %v745_v58, %v792_v59  ;;  %v793_v14 = vld [vmem:[#allocation2 + $0xc9] sm:$0xff]  ;;  %v582_v18 = vadd.f32 %v3612_v53, %v581_v13 }
 0x131   : > { %v932_v11 = vld [vmem:[#allocation2 + $0xcd] sm:$0xff]  ;;  %v933_v16 = vld [vmem:[#allocation2 + $0xd5] sm:$0xff]  ;;  %704 = vst.msk [vmem:[#allocation2 + $0x108] sm:$0xff] %vm670_vm4, %v587_v12  ;;  %v1072_v22 = vmax.f32 %v1025_v7, 0.0  ;;  %v3102_v23 = vpop.f32.mrb[34].mxu0  ;;  %v840_v27 = vmax.f32 %v746_v2, %v793_v14  ;;  %v888_v33 = vld [vmem:[#allocation2 + $0xe4] sm:$0xff] }
 0x132   : > { %1487 = vrot.lane.b32.xlu1 %v1224_v63, %s3417_s4  ;;  %v794_v15 = vld [vmem:[#allocation2 + $0xd1] sm:$0xff]  ;;  %v979_v17 = vmax.f32 %v885_v9, %v932_v11  ;;  %v1071_v19 = vmax.f32 %v1024_v6, 0.0  ;;  %v980_v20 = vmax.f32 %v886_v10, %v933_v16  ;;  %v1154_v21 = vld [vmem:[#allocation3 + $0x50] ss:$2 sm:$0xff]  ;;  %703 = vst.msk [vmem:[#allocation2 + $0x100] sm:$0xff] %vm670_vm4, %v582_v18  ;;  %v597_v30 = vadd.f32 %v3102_v23, %v3612_v53  ;;  %v591_v31 = vpop.f32.mrb[35].mxu0 }
 0x133   : > { %1697 = vrot.lane.b32.xlu0 %v1326_v1, %s3421_s8  ;;  %v1188_v25 = vld [vmem:[#allocation3 + $0x42] ss:$2 sm:$0xff]  ;;  %v841_v28 = vmax.f32 %v747_v4, %v794_v15  ;;  %v935_v35 = vld [vmem:[#allocation2 + $0xe5] sm:$0xff]  ;;  %1119 = vst.msk [vmem:[#allocation3 + $0xb0] sm:$0xff] %vm670_vm4, %v1072_v22  ;;  %v592_v36 = vadd.f32 %v3612_v53, %v591_v31 }
 0x134   : > { %1118 = vst.msk [vmem:[#allocation3 + $0xa8] sm:$0xff] %vm670_vm4, %v1071_v19  ;;  %v1026_v24 = vmax.f32 %v838_v3, %v979_v17  ;;  %v3762_v26 = vld [vmem:[#allocation2 + $0xd8] sm:$0xff]  ;;  %v1027_v32 = vmax.f32 %v839_v8, %v980_v20  ;;  %v749_v38 = vld [vmem:[#allocation2 + $0xe0] sm:$0xff]  ;;  %v982_v42 = vmax.f32 %v888_v33, %v935_v35  ;;  %706 = vst.msk [vmem:[#allocation2 + $0x118] sm:$0xff] %vm670_vm4, %v597_v30 }
 0x135   : > { %v887_v29 = vld [vmem:[#allocation2 + $0xdc] sm:$0xff]  ;;  %705 = vst.msk [vmem:[#allocation2 + $0x110] sm:$0xff] %vm670_vm4, %v592_v36  ;;  %v1258_v44 = vld [vmem:[#allocation3 + $0x58] ss:$2 sm:$0xff]  ;;  %v3105_v47 = vpop.f32.mrb[36].mxu0 }
 0x136   : > { %1767 = vrot.lane.b32.xlu1 %v1154_v21, %s3422_s14  ;;  %v934_v34 = vld [vmem:[#allocation2 + $0xdd] sm:$0xff]  ;;  %v1073_v37 = vmax.f32 %v1026_v24, 0.0  ;;  %v750_v45 = vld [vmem:[#allocation2 + $0xe8] sm:$0xff]  ;;  %v1074_v46 = vmax.f32 %v1027_v32, 0.0  ;;  %v1029_v49 = vmax.f32 %v841_v28, %v982_v42  ;;  %v890_v55 = vld [vmem:[#allocation2 + $0xf4] sm:$0xff]  ;;  %v607_v56 = vadd.f32 %v3105_v47, %v3612_v53  ;;  %v601_v57 = vpop.f32.mrb[37].mxu0 }
 0x137   : > { %1415 = vrot.lane.b32.xlu0 %v1188_v25, %s3418_s5  ;;  %v795_v39 = vld [vmem:[#allocation2 + $0xd9] sm:$0xff]  ;;  %v796_v40 = vld [vmem:[#allocation2 + $0xe1] sm:$0xff]  ;;  %v981_v41 = vmax.f32 %v887_v29, %v934_v34  ;;  %v797_v52 = vld [vmem:[#allocation2 + $0xe9] sm:$0xff]  ;;  %v602_v60 = vadd.f32 %v3612_v53, %v601_v57 }
 0x138   : > { %v1190_v43 = vld [vmem:[#allocation3 + $0x52] ss:$2 sm:$0xff]  ;;  %1120 = vst.msk [vmem:[#allocation3 + $0xb8] sm:$0xff] %vm670_vm4, %v1073_v37  ;;  %v842_v50 = vmax.f32 %v3762_v26, %v795_v39  ;;  %v843_v51 = vmax.f32 %v749_v38, %v796_v40  ;;  %v937_v59 = vld [vmem:[#allocation2 + $0xf5] sm:$0xff]  ;;  %1121 = vst.msk [vmem:[#allocation3 + $0xc0] sm:$0xff] %vm670_vm4, %v1074_v46  ;;  %v1076_v62 = vmax.f32 %v1029_v49, 0.0  ;;  %v844_v5 = vmax.f32 %v750_v45, %v797_v52 }
 0x139   : > { %v1028_v48 = vmax.f32 %v840_v27, %v981_v41  ;;  %v889_v54 = vld [vmem:[#allocation2 + $0xec] sm:$0xff]  ;;  %v984_v2 = vmax.f32 %v890_v55, %v937_v59  ;;  %708 = vst.msk [vmem:[#allocation2 + $0x128] sm:$0xff] %vm670_vm4, %v607_v56  ;;  %v1292_v3 = vld [vmem:[#allocation3 + $0x4a] ss:$2 sm:$0xff]  ;;  %707 = vst.msk [vmem:[#allocation2 + $0x120] sm:$0xff] %vm670_vm4, %v602_v60  ;;  %v3108_v6 = vpop.f32.mrb[38].mxu0 }
 0x13a   : > { %1826 = vrot.lane.b32.xlu1 %v1190_v43, %s3423_s16  ;;  %v936_v58 = vld [vmem:[#allocation2 + $0xed] sm:$0xff]  ;;  %v1328_v4 = vld [vmem:[#allocation3 + $0x4c] ss:$2 sm:$0xff]  ;;  %1123 = vst.msk [vmem:[#allocation3 + $0xd0] sm:$0xff] %vm670_vm4, %v1076_v62  ;;  %v617_v7 = vadd.f32 %v3108_v6, %v3612_v53  ;;  %v611_v8 = vpop.f32.mrb[39].mxu0 }
 0x13b   : > { %1557 = vrot.lane.b32.xlu0 %v1258_v44, %s3419_s6  ;;  %v1075_v61 = vmax.f32 %v1028_v48, 0.0  ;;  %v751_v63 = vld [vmem:[#allocation2 + $0xf0] sm:$0xff]  ;;  %v983_v1 = vmax.f32 %v889_v54, %v936_v58  ;;  %v1031_v10 = vmax.f32 %v843_v51, %v984_v2  ;;  %v891_v12 = vld [vmem:[#allocation2 + $0xfc] sm:$0xff]  ;;  %v892_v13 = vld [vmem:[#allocation2 + $0x104] sm:$0xff]  ;;  %v612_v15 = vadd.f32 %v3612_v53, %v611_v8  ;;  %v3117_v58 = vpop.f32.mrb[0].mxu1 }
 0x13c   : > { %v798_v0 = vld [vmem:[#allocation2 + $0xf1] sm:$0xff]  ;;  %v938_v14 = vld [vmem:[#allocation2 + $0xfd] sm:$0xff]  ;;  %v939_v18 = vld [vmem:[#allocation2 + $0x105] sm:$0xff]  ;;  %710 = vst.msk [vmem:[#allocation2 + $0x138] sm:$0xff] %vm670_vm4, %v617_v7  ;;  %v641_v62 = vpop.f32.mrb[1].mxu1 }
 0x13d   : > { %1122 = vst.msk [vmem:[#allocation3 + $0xc8] sm:$0xff] %vm670_vm4, %v1075_v61  ;;  %v1030_v9 = vmax.f32 %v842_v50, %v983_v1  ;;  %v845_v11 = vmax.f32 %v751_v63, %v798_v0  ;;  %v752_v16 = vld [vmem:[#allocation2 + $0xf8] sm:$0xff]  ;;  %v985_v19 = vmax.f32 %v891_v12, %v938_v14  ;;  %v1226_v21 = vld [vmem:[#allocation3 + $0x54] ss:$2 sm:$0xff]  ;;  %v986_v22 = vmax.f32 %v892_v13, %v939_v18  ;;  %v3111_v23 = vpop.f32.mrb[40].mxu0 }
 0x13e   : > { %1627 = vrot.lane.b32.xlu1 %v1292_v3, %s3420_s7  ;;  %v799_v17 = vld [vmem:[#allocation2 + $0xf9] sm:$0xff]  ;;  %709 = vst.msk [vmem:[#allocation2 + $0x130] sm:$0xff] %vm670_vm4, %v612_v15  ;;  %v1078_v24 = vmax.f32 %v1031_v10, 0.0  ;;  %v893_v27 = vld [vmem:[#allocation2 + $0x10c] sm:$0xff]  ;;  %v627_v28 = vadd.f32 %v3111_v23, %v3612_v53  ;;  %v621_v29 = vpop.f32.mrb[41].mxu0  ;;  %v800_v46 = vld [vmem:[#allocation2 + $0x101] sm:$0xff]  ;;  %v647_v61 = vadd.f32 %v3117_v58, %v3612_v53  ;;  %v642_v0 = vadd.f32 %v3612_v53, %v641_v62 }
 0x13f   : > { %1699 = vrot.lane.b32.xlu0 %v1328_v4, %s3421_s8  ;;  %v1077_v20 = vmax.f32 %v1030_v9, 0.0  ;;  %v1032_v25 = vmax.f32 %v844_v5, %v985_v19  ;;  %v846_v26 = vmax.f32 %v752_v16, %v799_v17  ;;  %v1033_v30 = vmax.f32 %v845_v11, %v986_v22  ;;  %v940_v31 = vld [vmem:[#allocation2 + $0x10d] sm:$0xff]  ;;  %v753_v45 = vld [vmem:[#allocation2 + $0x100] sm:$0xff]  ;;  %v941_v50 = vld [vmem:[#allocation2 + $0x115] sm:$0xff] }
 0x140   : > { %v622_v32 = vadd.f32 %v3612_v53, %v621_v29  ;;  %1125 = vst.msk [vmem:[#allocation3 + $0xe0] sm:$0xff] %vm670_vm4, %v1078_v24  ;;  %v1294_v35 = vld [vmem:[#allocation3 + $0x5a] ss:$2 sm:$0xff]  ;;  %v987_v36 = vmax.f32 %v893_v27, %v940_v31  ;;  %712 = vst.msk [vmem:[#allocation2 + $0x148] sm:$0xff] %vm670_vm4, %v627_v28  ;;  %v895_v47 = vld [vmem:[#allocation2 + $0x11c] sm:$0xff]  ;;  %v847_v56 = vmax.f32 %v753_v45, %v800_v46 }
 0x141   : > { %1124 = vst.msk [vmem:[#allocation3 + $0xd8] sm:$0xff] %vm670_vm4, %v1077_v20  ;;  %v3114_v33 = vpop.f32.mrb[42].mxu0  ;;  %v1079_v34 = vmax.f32 %v1032_v25, 0.0  ;;  %v1228_v38 = vld [vmem:[#allocation3 + $0x64] ss:$2 sm:$0xff]  ;;  %v754_v40 = vld [vmem:[#allocation2 + $0x108] sm:$0xff] }
 0x142   : > { %1885 = vrot.lane.b32.xlu1 %v1226_v21, %s3424_s17  ;;  %v637_v37 = vadd.f32 %v3114_v33, %v3612_v53  ;;  %711 = vst.msk [vmem:[#allocation2 + $0x140] sm:$0xff] %vm670_vm4, %v622_v32  ;;  %v3800_v39 = vld [vmem:[#allocation3 + $0x60] ss:$2 sm:$0xff]  ;;  %v631_v42 = vpop.f32.mrb[43].mxu0  ;;  %v1034_v44 = vmax.f32 %v846_v26, %v987_v36  ;;  %716 = vst.msk [vmem:[#allocation2 + $0x168] sm:$0xff] %vm670_vm4, %v647_v61  ;;  %v2092_v9 = vld [vmem:[%s4561_s1 + $0x20] sm:$0xff] }
 0x143   : > { %1417 = vrot.lane.b32.xlu0 %v1190_v43, %s3418_s5  ;;  %1126 = vst.msk [vmem:[#allocation3 + $0xe8] sm:$0xff] %vm670_vm4, %v1079_v34  ;;  %v801_v41 = vld [vmem:[#allocation2 + $0x109] sm:$0xff]  ;;  %v1080_v43 = vmax.f32 %v1033_v30, 0.0  ;;  %v632_v48 = vadd.f32 %v3612_v53, %v631_v42  ;;  %v894_v49 = vld [vmem:[#allocation2 + $0x114] sm:$0xff]  ;;  %v942_v51 = vld [vmem:[#allocation2 + $0x11d] sm:$0xff] }
 0x144   : > { %714 = vst.msk [vmem:[#allocation2 + $0x158] sm:$0xff] %vm670_vm4, %v637_v37  ;;  %v1081_v52 = vmax.f32 %v1034_v44, 0.0  ;;  %v848_v54 = vmax.f32 %v754_v40, %v801_v41  ;;  %v989_v55 = vmax.f32 %v895_v47, %v942_v51  ;;  %v988_v57 = vmax.f32 %v894_v49, %v941_v50  ;;  %v1260_v59 = vld [vmem:[#allocation3 + $0x68] ss:$2 sm:$0xff]  ;;  %v2090_v1 = vld [vmem:[%s4561_s1 + $0x10] sm:$0xff]  ;;  %715 = vst.msk [vmem:[#allocation2 + $0x160] sm:$0xff] %vm670_vm4, %v642_v0 }
 0x145   : > { %1127 = vst.msk [vmem:[#allocation3 + $0xf0] sm:$0xff] %vm670_vm4, %v1080_v43  ;;  %713 = vst.msk [vmem:[#allocation2 + $0x150] sm:$0xff] %vm670_vm4, %v632_v48  ;;  %v1192_v60 = vld [vmem:[#allocation3 + $0x62] ss:$2 sm:$0xff]  ;;  %v896_v11 = vld [vmem:[#allocation2 + $0x124] sm:$0xff] }
 0x146   : > { %1629 = vrot.lane.b32.xlu1 %v1294_v35, %s3420_s7  ;;  %1128 = vst.msk [vmem:[#allocation3 + $0xf8] sm:$0xff] %vm670_vm4, %v1081_v52  ;;  %v1036_v63 = vmax.f32 %v848_v54, %v989_v55  ;;  %v2091_v2 = vld [vmem:[%s4561_s1 + $0x18] sm:$0xff]  ;;  %v1035_v3 = vmax.f32 %v847_v56, %v988_v57  ;;  %v3824_v7 = vld [vmem:[#allocation3 + $0x70] ss:$2 sm:$0xff]  ;;  %v755_v8 = vld [vmem:[#allocation2 + $0x110] sm:$0xff] }
 0x147   : > { %1489 = vrot.lane.b32.xlu0 %v1226_v21, %s3417_s4  ;;  %v1330_v4 = vld [vmem:[#allocation3 + $0x5c] ss:$2 sm:$0xff]  ;;  %v3238_v5 = vpack.c.bf16 %v2091_v2, %v2090_v1  ;;  %v2096_v28 = vld [vmem:[%s4561_s1 + $0x40] sm:$0x3f] }
 0x148   : > { %v1082_v53 = vmax.f32 %v1035_v3, 0.0  ;;  %v1083_v6 = vmax.f32 %v1036_v63, 0.0  ;;  %v802_v10 = vld [vmem:[#allocation2 + $0x111] sm:$0xff]  ;;  %v2093_v12 = vld [vmem:[%s4561_s1 + $0x28] sm:$0xff]  ;;  %v803_v19 = vld [vmem:[#allocation2 + $0x119] sm:$0xff] }
 0x149   : > { %3239 = vmatprep.subr.bf16.mxu1 %v3238_v5  ;;  %v943_v13 = vld [vmem:[#allocation2 + $0x125] sm:$0xff]  ;;  %v3242_v14 = vpack.c.bf16 %v2093_v12, %v2092_v9  ;;  %v2094_v15 = vld [vmem:[%s4561_s1 + $0x30] sm:$0xff]  ;;  %v2095_v16 = vld [vmem:[%s4561_s1 + $0x38] sm:$0xff]  ;;  %v849_v22 = vmax.f32 %v755_v8, %v802_v10 }
 0x14a   : > { %1887 = vrot.lane.b32.xlu1 %v1228_v38, %s3424_s17  ;;  %3241 = vmatpush3.bf16.msra.mxu1 %v3238_v5  ;;  %1129 = vst.msk [vmem:[#allocation3 + $0x100] sm:$0xff] %vm670_vm4, %v1082_v53  ;;  %1130 = vst.msk [vmem:[#allocation3 + $0x108] sm:$0xff] %vm670_vm4, %v1083_v6  ;;  %v756_v17 = vld [vmem:[#allocation2 + $0x118] sm:$0xff]  ;;  %v3246_v18 = vpack.c.bf16 %v2095_v16, %v2094_v15  ;;  %v897_v20 = vld [vmem:[#allocation2 + $0x12c] sm:$0xff]  ;;  %v990_v23 = vmax.f32 %v896_v11, %v943_v13  ;;  %v3120_v11 = vpop.f32.mrb[2].mxu1 }
 0x14b   : > { %1769 = vrot.lane.b32.xlu0 %v3800_v39, %s3422_s14  ;;  %v944_v21 = vld [vmem:[#allocation2 + $0x12d] sm:$0xff]  ;;  %3243 = vmatprep.subr.bf16.mxu1 %v3242_v14  ;;  %v850_v26 = vmax.f32 %v756_v17, %v803_v19  ;;  %v1296_v29 = vld [vmem:[#allocation3 + $0x6a] ss:$2 sm:$0xff] }
 0x14c   : > { %v1194_v24 = vld [vmem:[#allocation3 + $0x72] ss:$2 sm:$0xff]  ;;  %v991_v27 = vmax.f32 %v897_v20, %v944_v21  ;;  %v1037_v33 = vmax.f32 %v849_v22, %v990_v23  ;;  %v898_v36 = vld [vmem:[#allocation2 + $0x134] sm:$0xff] }
 0x14d   : > { %v1262_v25 = vld [vmem:[#allocation3 + $0x78] ss:$2 sm:$0xff]  ;;  %v757_v32 = vld [vmem:[#allocation2 + $0x120] sm:$0xff]  ;;  %v760_v61 = vld [vmem:[#allocation2 + $0x138] sm:$0xff] }
 0x14e   : > { %1559 = vrot.lane.b32.xlu1 %v1260_v59, %s3419_s6  ;;  %3245 = vmatpush3.bf16.msra.mxu1 %v3242_v14  ;;  %v1332_v30 = vld [vmem:[#allocation3 + $0x6c] ss:$2 sm:$0xff]  ;;  %v1084_v42 = vmax.f32 %v1037_v33, 0.0  ;;  %v759_v45 = vld [vmem:[#allocation2 + $0x130] sm:$0xff]  ;;  %v651_v14 = vpop.f32.mrb[3].mxu1 }
 0x14f   : > { %1828 = vrot.lane.b32.xlu0 %v1192_v60, %s3423_s16  ;;  %3247 = vmatprep.subr.bf16.mxu1 %v3246_v18  ;;  %v758_v31 = vld [vmem:[#allocation2 + $0x128] sm:$0xff]  ;;  %v945_v37 = vld [vmem:[#allocation2 + $0x135] sm:$0xff]  ;;  %v946_v41 = vld [vmem:[#allocation2 + $0x13d] sm:$0xff]  ;;  %v3123_v16 = vpop.f32.mrb[4].mxu1 }
 0x150   : > { %v804_v34 = vld [vmem:[#allocation2 + $0x121] sm:$0xff]  ;;  %v805_v35 = vld [vmem:[#allocation2 + $0x129] sm:$0xff]  ;;  %v992_v47 = vmax.f32 %v898_v36, %v945_v37  ;;  %v806_v49 = vld [vmem:[#allocation2 + $0x131] sm:$0xff]  ;;  %1131 = vst.msk [vmem:[#allocation3 + $0x110] sm:$0xff] %vm670_vm4, %v1084_v42  ;;  %v661_v21 = vpop.f32.mrb[5].mxu1 }
 0x151   : > { %v899_v40 = vld [vmem:[#allocation2 + $0x13c] sm:$0xff]  ;;  %v1230_v43 = vld [vmem:[#allocation3 + $0x74] ss:$2 sm:$0xff]  ;;  %v851_v44 = vmax.f32 %v757_v32, %v804_v34  ;;  %v852_v46 = vmax.f32 %v758_v31, %v805_v35  ;;  %v853_v55 = vmax.f32 %v759_v45, %v806_v49 }
 0x152   : > { %1491 = vrot.lane.b32.xlu1 %v1228_v38, %s3417_s4  ;;  %3249 = vmatpush3.bf16.msra.mxu1 %v3246_v18  ;;  %v1038_v38 = vmax.f32 %v850_v26, %v991_v27  ;;  %v993_v48 = vmax.f32 %v899_v40, %v946_v41  ;;  %v900_v50 = vld [vmem:[#allocation2 + $0x144] sm:$0xff]  ;;  %v1232_v59 = vld [vmem:[#allocation3 + $0x84] ss:$2 sm:$0xff]  ;;  %v901_v2 = vld [vmem:[#allocation2 + $0x14c] sm:$0xff] }
 0x153   : > { %1701 = vrot.lane.b32.xlu0 %v1330_v4, %s3421_s8  ;;  %3136 = vmatprep.subr.msk.mxu1 %vm2157_vm5, %v2096_v28  ;;  %v947_v51 = vld [vmem:[#allocation2 + $0x145] sm:$0xff]  ;;  %v1039_v56 = vmax.f32 %v851_v44, %v992_v47  ;;  %v807_v1 = vld [vmem:[#allocation2 + $0x139] sm:$0xff]  ;;  %v948_v3 = vld [vmem:[#allocation2 + $0x14d] sm:$0xff] }
 0x154   : > { %v1085_v52 = vmax.f32 %v1038_v38, 0.0  ;;  %v1298_v54 = vld [vmem:[#allocation3 + $0x7a] ss:$2 sm:$0xff]  ;;  %v994_v57 = vmax.f32 %v900_v50, %v947_v51  ;;  %v1040_v58 = vmax.f32 %v852_v46, %v993_v48  ;;  %v854_v53 = vmax.f32 %v760_v61, %v807_v1  ;;  %v761_v19 = vld [vmem:[#allocation2 + $0x140] sm:$0xff] }
 0x155   : > { %v1086_v63 = vmax.f32 %v1039_v56, 0.0  ;;  %v1264_v4 = vld [vmem:[#allocation3 + $0x88] ss:$2 sm:$0xff]  ;;  %v995_v6 = vmax.f32 %v901_v2, %v948_v3  ;;  %v3350_v12 = vld [vmem:[%s4561_s1 + $0x130] ss:$0 sm:$0xff]  ;;  %v762_v18 = vld [vmem:[#allocation2 + $0x148] sm:$0xff] }
 0x156   : > { %1771 = vrot.lane.b32.xlu1 %v3824_v7, %s3422_s14  ;;  %3137 = vmatpush3.msk.msra.mxu1 %vm2157_vm5, %v2096_v28  ;;  %1132 = vst.msk [vmem:[#allocation3 + $0x118] sm:$0xff] %vm670_vm4, %v1085_v52  ;;  %v1041_v62 = vmax.f32 %v853_v55, %v994_v57  ;;  %v1087_v0 = vmax.f32 %v1040_v58, 0.0  ;;  %v1196_v5 = vld [vmem:[#allocation3 + $0x82] ss:$2 sm:$0xff]  ;;  %v657_v13 = vadd.f32 %v3350_v12, %v3120_v11  ;;  %v808_v23 = vld [vmem:[#allocation2 + $0x141] sm:$0xff]  ;;  %vm2537_vm5 = vcmask 883712  }
 0x157   : > { %1419 = vrot.lane.b32.xlu0 %v1192_v60, %s3418_s5  ;;  %v3858_v60 = vld [vmem:[#allocation3 + $0x80] ss:$2 sm:$0xff]  ;;  %1133 = vst.msk [vmem:[#allocation3 + $0x120] sm:$0xff] %vm670_vm4, %v1086_v63  ;;  %v1042_v10 = vmax.f32 %v854_v53, %v995_v6  ;;  %v652_v15 = vadd.f32 %v3350_v12, %v651_v14  ;;  %v3873_v17 = vld [vmem:[#allocation3 + $0x90] ss:$2 sm:$0xff]  ;;  %v667_v20 = vadd.f32 %v3350_v12, %v3123_v16 }
 0x158   : > { %1134 = vst.msk [vmem:[#allocation3 + $0x128] sm:$0xff] %vm670_vm4, %v1087_v0  ;;  %v1088_v8 = vmax.f32 %v1041_v62, 0.0  ;;  %v1334_v9 = vld [vmem:[#allocation3 + $0x7c] ss:$2 sm:$0xff]  ;;  %718 = vst.msk [vmem:[#allocation2 + $0x178] sm:$0xff] %vm670_vm4, %v657_v13  ;;  %v662_v26 = vadd.f32 %v3350_v12, %v661_v21  ;;  %v903_v28 = vld [vmem:[#allocation2 + $0x15c] sm:$0xff]  ;;  %v855_v32 = vmax.f32 %v761_v19, %v808_v23 }
 0x159   : > { %v1089_v22 = vmax.f32 %v1042_v10, 0.0  ;;  %717 = vst.msk [vmem:[#allocation2 + $0x170] sm:$0xff] %vm670_vm4, %v652_v15  ;;  %v949_v27 = vld [vmem:[#allocation2 + $0x155] sm:$0xff]  ;;  %720 = vst.msk [vmem:[#allocation2 + $0x188] sm:$0xff] %vm670_vm4, %v667_v20  ;;  %v904_v38 = vld [vmem:[#allocation2 + $0x164] sm:$0xff] }
 0x15a   : > { %1830 = vrot.lane.b32.xlu1 %v1194_v24, %s3423_s16  ;;  %1135 = vst.msk [vmem:[#allocation3 + $0x130] sm:$0xff] %vm670_vm4, %v1088_v8  ;;  %719 = vst.msk [vmem:[#allocation2 + $0x180] sm:$0xff] %vm670_vm4, %v662_v26  ;;  %v1266_v31 = vld [vmem:[#allocation3 + $0x98] ss:$2 sm:$0xff]  ;;  %v765_v49 = vld [vmem:[#allocation2 + $0x160] sm:$0xff] }
 0x15b   : > { %1561 = vrot.lane.b32.xlu0 %v1262_v25, %s3419_s6  ;;  %v902_v25 = vld [vmem:[#allocation2 + $0x154] sm:$0xff]  ;;  %1136 = vst.msk [vmem:[#allocation3 + $0x138] sm:$0xff] %vm670_vm4, %v1089_v22  ;;  %v951_v40 = vld [vmem:[#allocation2 + $0x165] sm:$0xff] }
 0x15c   : > { %v763_v33 = vld [vmem:[#allocation2 + $0x150] sm:$0xff]  ;;  %v996_v36 = vmax.f32 %v902_v25, %v949_v27  ;;  %v1300_v41 = vld [vmem:[#allocation3 + $0x8a] ss:$2 sm:$0xff]  ;;  %v998_v45 = vmax.f32 %v904_v38, %v951_v40 }
 0x15d   : > { %v810_v34 = vld [vmem:[#allocation2 + $0x151] sm:$0xff]  ;;  %v1336_v42 = vld [vmem:[#allocation3 + $0x8c] ss:$2 sm:$0xff] }
 0x15e   : > { %1631 = vrot.lane.b32.xlu1 %v1296_v29, %s3420_s7  ;;  %v950_v29 = vld [vmem:[#allocation2 + $0x15d] sm:$0xff]  ;;  %v1043_v44 = vmax.f32 %v855_v32, %v996_v36  ;;  %v766_v48 = vld [vmem:[#allocation2 + $0x168] sm:$0xff] }
 0x15f   : > { %1703 = vrot.lane.b32.xlu0 %v1332_v30, %s3421_s8  ;;  %v1198_v30 = vld [vmem:[#allocation3 + $0x92] ss:$2 sm:$0xff]  ;;  %v997_v37 = vmax.f32 %v903_v28, %v950_v29  ;;  %v1200_v20 = vld [vmem:[#allocation3 + $0xa2] ss:$2 sm:$0xff] }
 0x160   : > { %v1234_v47 = vld [vmem:[#allocation3 + $0x94] ss:$2 sm:$0xff]  ;;  %v906_v55 = vld [vmem:[#allocation2 + $0x174] sm:$0xff]  ;;  %v1090_v63 = vmax.f32 %v1043_v44, 0.0 }
 0x161   : > { %v812_v50 = vld [vmem:[#allocation2 + $0x161] sm:$0xff]  ;;  %v767_v51 = vld [vmem:[#allocation2 + $0x170] sm:$0xff] }
 0x162   : > { %1889 = vrot.lane.b32.xlu1 %v1230_v43, %s3424_s17  ;;  %v813_v52 = vld [vmem:[#allocation2 + $0x169] sm:$0xff]  ;;  %v953_v56 = vld [vmem:[#allocation2 + $0x175] sm:$0xff]  ;;  %v954_v61 = vld [vmem:[#allocation2 + $0x17d] sm:$0xff]  ;;  %v859_v1 = vmax.f32 %v765_v49, %v812_v50  ;;  %1137 = vst.msk [vmem:[#allocation3 + $0x140] sm:$0xff] %vm670_vm4, %v1090_v63 }
 0x163   : > { %1421 = vrot.lane.b32.xlu0 %v1194_v24, %s3418_s5  ;;  %v809_v24 = vld [vmem:[#allocation2 + $0x149] sm:$0xff]  ;;  %v907_v57 = vld [vmem:[#allocation2 + $0x17c] sm:$0xff]  ;;  %v860_v2 = vmax.f32 %v766_v48, %v813_v52 }
 0x164   : > { %v856_v35 = vmax.f32 %v762_v18, %v809_v24  ;;  %v955_v62 = vld [vmem:[#allocation2 + $0x185] sm:$0xff]  ;;  %v1001_v53 = vmax.f32 %v907_v57, %v954_v61  ;;  %v1236_v11 = vld [vmem:[#allocation3 + $0xa4] ss:$2 sm:$0xff] }
 0x165   : > { %v1302_v3 = vld [vmem:[#allocation3 + $0x9a] ss:$2 sm:$0xff]  ;;  %v1304_v36 = vld [vmem:[#allocation3 + $0xaa] ss:$2 sm:$0xff] }
 0x166   : > { %1633 = vrot.lane.b32.xlu1 %v1298_v54, %s3420_s7  ;;  %v1044_v46 = vmax.f32 %v856_v35, %v997_v37  ;;  %v814_v54 = vld [vmem:[#allocation2 + $0x171] sm:$0xff]  ;;  %v1048_v14 = vmax.f32 %v860_v2, %v1001_v53  ;;  %v3918_v29 = vld [vmem:[#allocation3 + $0xb0] ss:$2 sm:$0xff] }
 0x167   : > { %1493 = vrot.lane.b32.xlu0 %v1230_v43, %s3417_s4  ;;  %v857_v43 = vmax.f32 %v763_v33, %v810_v34  ;;  %v3898_v12 = vld [vmem:[#allocation3 + $0xa0] ss:$2 sm:$0xff] }
 0x168   : > { %v1091_v0 = vmax.f32 %v1044_v46, 0.0  ;;  %v1268_v19 = vld [vmem:[#allocation3 + $0xa8] ss:$2 sm:$0xff]  ;;  %v1095_v22 = vmax.f32 %v1048_v14, 0.0  ;;  %v1270_v33 = vld [vmem:[#allocation3 + $0xb8] ss:$2 sm:$0xff] }
 0x169   : > { %v1045_v58 = vmax.f32 %v857_v43, %v998_v45  ;;  %v1338_v26 = vld [vmem:[#allocation3 + $0x9c] ss:$2 sm:$0xff]  ;;  %v1340_v37 = vld [vmem:[#allocation3 + $0xac] ss:$2 sm:$0xff] }
 0x16a   : > { %1891 = vrot.lane.b32.xlu1 %v1232_v59, %s3424_s17  ;;  %1138 = vst.msk [vmem:[#allocation3 + $0x148] sm:$0xff] %vm670_vm4, %v1091_v0  ;;  %1142 = vst.msk [vmem:[#allocation3 + $0x168] sm:$0xff] %vm670_vm4, %v1095_v22  ;;  %v1202_v32 = vld [vmem:[#allocation3 + $0xb2] ss:$2 sm:$0xff]  ;;  %v764_v45 = vld [vmem:[#allocation2 + $0x158] sm:$0xff] }
 0x16b   : > { %1773 = vrot.lane.b32.xlu0 %v3858_v60, %s3422_s14  ;;  %v1092_v8 = vmax.f32 %v1045_v58, 0.0  ;;  %v1306_v44 = vld [vmem:[#allocation3 + $0xba] ss:$2 sm:$0xff]  ;;  %v811_v46 = vld [vmem:[#allocation2 + $0x159] sm:$0xff] }
 0x16c   : > { %v952_v48 = vld [vmem:[#allocation2 + $0x16d] sm:$0xff]  ;;  %v1272_v61 = vld [vmem:[#allocation3 + $0xc8] ss:$2 sm:$0xff] }
 0x16d   : > { %1139 = vst.msk [vmem:[#allocation3 + $0x150] sm:$0xff] %vm670_vm4, %v1092_v8  ;;  %v3947_v52 = vld [vmem:[#allocation3 + $0xc0] ss:$2 sm:$0xff]  ;;  %v3975_v14 = vld [vmem:[#allocation3 + $0xd0] ss:$2 sm:$0xff] }
 0x16e   : > { %1563 = vrot.lane.b32.xlu1 %v1264_v4, %s3419_s6  ;;  %v861_v4 = vmax.f32 %v767_v51, %v814_v54  ;;  %v1240_v51 = vld [vmem:[#allocation3 + $0xc4] ss:$2 sm:$0xff]  ;;  %v858_v54 = vmax.f32 %v764_v45, %v811_v46 }
 0x16f   : > { %1832 = vrot.lane.b32.xlu0 %v1196_v5, %s3423_s16  ;;  %v1206_v22 = vld [vmem:[#allocation3 + $0xd2] ss:$2 sm:$0xff] }
 0x172   : > { %1495 = vrot.lane.b32.xlu1 %v1232_v59, %s3417_s4  ;;  %v908_v59 = vld [vmem:[#allocation2 + $0x184] sm:$0xff] }
 0x173   : > { %1705 = vrot.lane.b32.xlu0 %v1334_v9, %s3421_s8  ;;  %v1002_v6 = vmax.f32 %v908_v59, %v955_v62  ;;  %v1204_v62 = vld [vmem:[#allocation3 + $0xc2] ss:$2 sm:$0xff] }
 0x175   : > { %v1049_v15 = vmax.f32 %v861_v4, %v1002_v6 }
 0x176   : > { %1775 = vrot.lane.b32.xlu1 %v3873_v17, %s3422_s14 }
 0x177   : > { %1423 = vrot.lane.b32.xlu0 %v1196_v5, %s3418_s5  ;;  %v1000_v5 = vmax.f32 %v906_v55, %v953_v56  ;;  %v1096_v23 = vmax.f32 %v1049_v15, 0.0  ;;  %v1144_v56 = vld [vmem:[#allocation3] ss:$2 sm:$0xff]  ;;  %v1146_v15 = vld [vmem:[#allocation3 + $0x10] ss:$2 sm:$0xff] }
 0x179   : > { %v1047_v13 = vmax.f32 %v859_v1, %v1000_v5  ;;  %1143 = vst.msk [vmem:[#allocation3 + $0x170] sm:$0xff] %vm670_vm4, %v1096_v23  ;;  %v1342_v5 = vld [vmem:[#allocation3 + $0xbc] ss:$2 sm:$0xff] }
 0x17a   : > { %1834 = vrot.lane.b32.xlu1 %v1198_v30, %s3423_s16  ;;  %v1274_v23 = vld [vmem:[#allocation3 + $0xd8] ss:$2 sm:$0xff] }
 0x17b   : > { %1565 = vrot.lane.b32.xlu0 %v1266_v31, %s3419_s6  ;;  %v1094_v21 = vmax.f32 %v1047_v13, 0.0 }
 0x17d   : > { %1141 = vst.msk [vmem:[#allocation3 + $0x160] sm:$0xff] %vm670_vm4, %v1094_v21 }
 0x17e   : > { %1635 = vrot.lane.b32.xlu1 %v1300_v41, %s3420_s7  ;;  %v1238_v41 = vld [vmem:[#allocation3 + $0xb4] ss:$2 sm:$0xff] }
 0x17f   : > { %1707 = vrot.lane.b32.xlu0 %v1336_v42, %s3421_s8 }
 0x182   : > { %1893 = vrot.lane.b32.xlu1 %v1234_v47, %s3424_s17 }
 0x183   : > { %1425 = vrot.lane.b32.xlu0 %v1198_v30, %s3418_s5 }
 0x184   : > { %v3895_v10 = vpop.permute.xlu0 %1407 }
 0x185   : > { %v1939_v57 = vsel %vm670_vm4, %v1144_v56, %v3895_v10 }
 0x186   : > { %1637 = vrot.lane.b32.xlu1 %v1302_v3, %s3420_s7 }
 0x187   : > { %1497 = vrot.lane.b32.xlu0 %v1234_v47, %s3417_s4  ;;  %v3893_v9 = vpop.permute.xlu1 %1479  ;;  %v905_v47 = vld [vmem:[#allocation2 + $0x16c] sm:$0xff] }
 0x188   : > { %v999_v55 = vmax.f32 %v905_v47, %v952_v48  ;;  %v1958_v0 = vsel %vm1957_vm6, %v1939_v57, %v3893_v9 }
 0x189   : > { %v3905_v18 = vpop.permute.xlu0 %1409 }
 0x18a   : > { %1895 = vrot.lane.b32.xlu1 %v1236_v11, %s3424_s17  ;;  %v1046_v63 = vmax.f32 %v858_v54, %v999_v55  ;;  %v1940_v21 = vsel %vm670_vm4, %v1146_v15, %v3905_v18  ;;  %v1148_v54 = vld [vmem:[#allocation3 + $0x20] ss:$2 sm:$0xff] }
 0x18b   : > { %1777 = vrot.lane.b32.xlu0 %v3898_v12, %s3422_s14  ;;  %v1312_v15 = vld [vmem:[#allocation3 + $0xea] ss:$2 sm:$0xff] }
 0x18c   : > { %v3903_v16 = vpop.permute.xlu1 %1481  ;;  %v1093_v6 = vmax.f32 %v1046_v63, 0.0 }
 0x18e   : > { %1567 = vrot.lane.b32.xlu1 %v1268_v19, %s3419_s6  ;;  %1140 = vst.msk [vmem:[#allocation3 + $0x158] sm:$0xff] %vm670_vm4, %v1093_v6 }
 0x18f   : > { %1836 = vrot.lane.b32.xlu0 %v1200_v20, %s3423_s16 }
 0x190   : > { %v3912_v24 = vpop.permute.xlu1 %1411 }
 0x191   : > { %v1552_v25 = vpop.permute.xlu0 %1551  ;;  %v1941_v55 = vsel %vm670_vm4, %v1148_v54, %v3912_v24 }
 0x192   : > { %1499 = vrot.lane.b32.xlu1 %v1236_v11, %s3417_s4  ;;  %v1977_v1 = vsel %vm1976_vm7, %v1958_v0, %v1552_v25  ;;  %v1959_v25 = vsel %vm1957_vm6, %v1940_v21, %v3903_v16  ;;  %v4062_v21 = vld [vmem:[#allocation3 + $0x100] ss:$2 sm:$0xff] }
 0x193   : > { %1709 = vrot.lane.b32.xlu0 %v1338_v26, %s3421_s8 }
 0x194   : > { %v3916_v27 = vpop.permute.xlu1 %1483 }
 0x195   : > { %v1624_v28 = vpop.permute.xlu0 %1623 }
 0x196   : > { %1779 = vrot.lane.b32.xlu1 %v3918_v29, %s3422_s14  ;;  %v1996_v4 = vsel %vm1995_vm8, %v1977_v1, %v1624_v28 }
 0x197   : > { %1427 = vrot.lane.b32.xlu0 %v1200_v20, %s3418_s5 }
 0x198   : > { %v3923_v30 = vpop.permute.xlu1 %1553 }
 0x199   : > { %v3925_v31 = vpop.permute.xlu0 %1413 }
 0x19a   : > { %1838 = vrot.lane.b32.xlu1 %v1202_v32, %s3423_s16 }
 0x19b   : > { %1569 = vrot.lane.b32.xlu0 %v1270_v33, %s3419_s6  ;;  %v1308_v33 = vld [vmem:[#allocation3 + $0xca] ss:$2 sm:$0xff] }
 0x19c   : > { %v1696_v34 = vpop.permute.xlu1 %1695 }
 0x19d   : > { %v3929_v35 = vpop.permute.xlu0 %1485  ;;  %v2015_v53 = vsel %vm2014_vm9, %v1996_v4, %v1696_v34  ;;  %v1344_v34 = vld [vmem:[#allocation3 + $0xcc] ss:$2 sm:$0xff] }
 0x19e   : > { %1639 = vrot.lane.b32.xlu1 %v1304_v36, %s3420_s7  ;;  %v4040_v4 = vld [vmem:[#allocation3 + $0xf0] ss:$2 sm:$0xff] }
 0x19f   : > { %1711 = vrot.lane.b32.xlu0 %v1340_v37, %s3421_s8 }
 0x1a0   : > { %v3933_v38 = vpop.permute.xlu1 %1555 }
 0x1a1   : > { %v3935_v40 = vpop.permute.xlu0 %1625 }
 0x1a2   : > { %1897 = vrot.lane.b32.xlu1 %v1238_v41, %s3424_s17 }
 0x1a3   : > { %1429 = vrot.lane.b32.xlu0 %v1202_v32, %s3418_s5  ;;  %v1978_v32 = vsel %vm1976_vm7, %v1959_v25, %v3923_v30  ;;  %v1242_v30 = vld [vmem:[#allocation3 + $0xd4] ss:$2 sm:$0xff] }
 0x1a4   : > { %v3939_v42 = vpop.permute.xlu1 %1487  ;;  %v1997_v36 = vsel %vm1995_vm8, %v1978_v32, %v3935_v40 }
 0x1a5   : > { %v3941_v43 = vpop.permute.xlu0 %1697 }
 0x1a6   : > { %1641 = vrot.lane.b32.xlu1 %v1306_v44, %s3420_s7  ;;  %v2016_v18 = vsel %vm2014_vm9, %v1997_v36, %v3941_v43  ;;  %v1310_v43 = vld [vmem:[#allocation3 + $0xda] ss:$2 sm:$0xff] }
 0x1a7   : > { %1501 = vrot.lane.b32.xlu0 %v1238_v41, %s3417_s4 }
 0x1a8   : > { %v1768_v49 = vpop.permute.xlu1 %1767 }
 0x1a9   : > { %v3945_v50 = vpop.permute.xlu0 %1415  ;;  %v2034_v8 = vsel %vm2033_vm10, %v2015_v53, %v1768_v49  ;;  %v4013_v49 = vld [vmem:[#allocation3 + $0xe4] ss:$2 sm:$0xff] }
 0x1aa   : > { %1899 = vrot.lane.b32.xlu1 %v1240_v51, %s3424_s17 }
 0x1ab   : > { %1781 = vrot.lane.b32.xlu0 %v3947_v52, %s3422_s14 }
 0x1ac   : > { %v1827_v58 = vpop.permute.xlu1 %1826 }
 0x1ad   : > { %v3954_v59 = vpop.permute.xlu0 %1557  ;;  %v2053_v9 = vsel %vm2052_vm11, %v2034_v8, %v1827_v58  ;;  %v1960_v58 = vsel %vm1957_vm6, %v1941_v55, %v3916_v27  ;;  %v1346_v27 = vld [vmem:[#allocation3 + $0xdc] ss:$2 sm:$0xff] }
 0x1ae   : > { %1571 = vrot.lane.b32.xlu1 %v1272_v61, %s3419_s6  ;;  %v1276_v61 = vld [vmem:[#allocation3 + $0xe8] ss:$2 sm:$0xff]  ;;  %v1979_v63 = vsel %vm1976_vm7, %v1960_v58, %v3933_v38 }
 0x1af   : > { %1840 = vrot.lane.b32.xlu0 %v1204_v62, %s3423_s16  ;;  %v1152_v55 = vld [vmem:[#allocation3 + $0x40] ss:$2 sm:$0xff]  ;;  %v4098_v58 = vld [vmem:[#allocation3 + $0x110] ss:$2 sm:$0xff] }
 0x1b0   : > { %v3961_v2 = vpop.permute.xlu1 %1627 }
 0x1b1   : > { %v3963_v3 = vpop.permute.xlu0 %1699  ;;  %v1998_v24 = vsel %vm1995_vm8, %v1979_v63, %v3961_v2 }
 0x1b2   : > { %1503 = vrot.lane.b32.xlu1 %v1240_v51, %s3417_s4  ;;  %v4015_v51 = vld [vmem:[#allocation3 + $0xe0] ss:$2 sm:$0xff] }
 0x1b3   : > { %1713 = vrot.lane.b32.xlu0 %v1342_v5, %s3421_s8  ;;  %v2017_v5 = vsel %vm2014_vm9, %v1998_v24, %v3963_v3 }
 0x1b4   : > { %v1886_v10 = vpop.permute.xlu1 %1885 }
 0x1b5   : > { %v3971_v11 = vpop.permute.xlu0 %1417  ;;  %v2072_v13 = vsel %vm2071_vm12, %v2053_v9, %v1886_v10  ;;  %v4052_v9 = vld [vmem:[#allocation3 + $0xf2] ss:$2 sm:$0xff] }
 0x1b6   : > { %1783 = vrot.lane.b32.xlu1 %v3975_v14, %s3422_s14  ;;  %3138 = vmatprep.mubr.msk.f32.mxu1 %vm2102_vm13, %v2072_v13  ;;  %v1278_v10 = vld [vmem:[#allocation3 + $0xf8] ss:$2 sm:$0xff] }
 0x1b7   : > { %1431 = vrot.lane.b32.xlu0 %v1204_v62, %s3418_s5  ;;  %v4027_v62 = vld [vmem:[#allocation3 + $0xe2] ss:$2 sm:$0xff] }
 0x1b8   : > { %v3981_v19 = vpop.permute.xlu1 %1629 }
 0x1b9   : > { %v3983_v20 = vpop.permute.xlu0 %1489 }
 0x1ba   : > { %1842 = vrot.lane.b32.xlu1 %v1206_v22, %s3423_s16 }
 0x1bb   : > { %1573 = vrot.lane.b32.xlu0 %v1274_v23, %s3419_s6 }
 0x1bc   : > { %v1888_v26 = vpop.permute.xlu1 %1887 }
 0x1bd   : > { %v1770_v28 = vpop.permute.xlu0 %1769 }
 0x1be   : > { %1643 = vrot.lane.b32.xlu1 %v1308_v33, %s3420_s7  ;;  %v2035_v37 = vsel %vm2033_vm10, %v2016_v18, %v1770_v28  ;;  %v1246_v33 = vld [vmem:[#allocation3 + $0xf4] ss:$2 sm:$0xff] }
 0x1bf   : > { %1715 = vrot.lane.b32.xlu0 %v1344_v34, %s3421_s8  ;;  %v4073_v34 = vld [vmem:[#allocation3 + $0x102] ss:$2 sm:$0xff] }
 0x1c0   : > { %v4000_v16 = vpop.permute.xlu1 %1559 }
 0x1c1   : > { %v1829_v41 = vpop.permute.xlu0 %1828 }
 0x1c2   : > { %v2054_v44 = vsel %vm2052_vm11, %v2035_v37, %v1829_v41  ;;  %1901 = vrot.lane.b32.xlu1 %v1242_v30, %s3424_s17  ;;  %v1348_v41 = vld [vmem:[#allocation3 + $0xec] ss:$2 sm:$0xff] }
 0x1c3   : > { %v2073_v45 = vsel %vm2071_vm12, %v2054_v44, %v1888_v26  ;;  %1433 = vrot.lane.b32.xlu0 %v1206_v22, %s3418_s5  ;;  %v1150_v22 = vld [vmem:[#allocation3 + $0x30] ss:$2 sm:$0xff] }
 0x1c4   : > { %3139 = vmatmul.mubr.msk.f32.vlgmr.msra.gmra.mrb[6].mxu1 %vm2102_vm13, %v2073_v45  ;;  %v4007_v40 = vpop.permute.xlu1 %1491  ;;  %v1942_v23 = vsel %vm670_vm4, %v1150_v22, %v3925_v31  ;;  %v1314_v44 = vld [vmem:[#allocation3 + $0xfa] ss:$2 sm:$0xff] }
 0x1c5   : > { %v1702_v46 = vpop.permute.xlu0 %1701  ;;  %v1961_v25 = vsel %vm1957_vm6, %v1942_v23, %v3929_v35 }
 0x1c6   : > { %1645 = vrot.lane.b32.xlu1 %v1310_v43, %s3420_s7  ;;  %v1980_v32 = vsel %vm1976_vm7, %v1961_v25, %v3954_v59  ;;  %v4091_v43 = vld [vmem:[#allocation3 + $0x104] ss:$2 sm:$0xff] }
 0x1c7   : > { %1505 = vrot.lane.b32.xlu0 %v1242_v30, %s3417_s4  ;;  %v1999_v36 = vsel %vm1995_vm8, %v1980_v32, %v3981_v19 }
 0x1c8   : > { %v1772_v47 = vpop.permute.xlu1 %1771  ;;  %v2018_v31 = vsel %vm2014_vm9, %v1999_v36, %v1702_v46  ;;  %v1350_v46 = vld [vmem:[#allocation3 + $0xfc] ss:$2 sm:$0xff] }
 0x1c9   : > { %v4011_v48 = vpop.permute.xlu0 %1419  ;;  %v2036_v38 = vsel %vm2033_vm10, %v2017_v5, %v1772_v47  ;;  %v1370_v5 = vld [vmem:[#allocation3 + $0x122] ss:$2 sm:$0xff] }
 0x1ca   : > { %1903 = vrot.lane.b32.xlu1 %v4013_v49, %s3424_s17 }
 0x1cb   : > { %1785 = vrot.lane.b32.xlu0 %v4015_v51, %s3422_s14 }
 0x1cc   : > { %v1831_v56 = vpop.permute.xlu1 %1830 }
 0x1cd   : > { %v4023_v57 = vpop.permute.xlu0 %1561  ;;  %v2055_v53 = vsel %vm2052_vm11, %v2036_v38, %v1831_v56  ;;  %v1360_v56 = vld [vmem:[#allocation3 + $0x120] ss:$2 sm:$0xff] }
 0x1ce   : > { %1575 = vrot.lane.b32.xlu1 %v1276_v61, %s3419_s6  ;;  %v1943_v61 = vsel %vm670_vm4, %v1152_v55, %v3945_v50  ;;  %v1214_v38 = vld [vmem:[#allocation3 + $0x112] ss:$2 sm:$0xff] }
 0x1cf   : > { %1844 = vrot.lane.b32.xlu0 %v4027_v62, %s3423_s16 }
 0x1d0   : > { %v4036_v0 = vpop.permute.xlu1 %1631 }
 0x1d1   : > { %v4038_v1 = vpop.permute.xlu0 %1703 }
 0x1d2   : > { %1787 = vrot.lane.b32.xlu1 %v4040_v4, %s3422_s14 }
 0x1d3   : > { %1717 = vrot.lane.b32.xlu0 %v1346_v27, %s3421_s8  ;;  %v1962_v27 = vsel %vm1957_vm6, %v1943_v61, %v3939_v42 }
 0x1d4   : > { %v1890_v2 = vpop.permute.xlu1 %1889 }
 0x1d5   : > { %v4049_v6 = vpop.permute.xlu0 %1421  ;;  %v2074_v8 = vsel %vm2071_vm12, %v2055_v53, %v1890_v2  ;;  %v1981_v53 = vsel %vm1976_vm7, %v1962_v27, %v4000_v16  ;;  %v1368_v27 = vld [vmem:[#allocation3 + $0x160] ss:$2 sm:$0xff] }
 0x1d6   : > { %1846 = vrot.lane.b32.xlu1 %v4052_v9, %s3423_s16  ;;  %3141 = vmatprep.mubr.msk.f32.mxu1 %vm2102_vm13, %v2074_v8  ;;  %v2000_v50 = vsel %vm1995_vm8, %v1981_v53, %v4036_v0 }
 0x1d7   : > { %1577 = vrot.lane.b32.xlu0 %v1278_v10, %s3419_s6  ;;  %v1380_v10 = vld [vmem:[#allocation3 + $0x124] ss:$2 sm:$0xff]  ;;  %v2019_v42 = vsel %vm2014_vm9, %v2000_v50, %v4038_v1 }
 0x1d8   : > { %v4058_v3 = vpop.permute.xlu1 %1633 }
 0x1d9   : > { %v4060_v13 = vpop.permute.xlu0 %1493 }
 0x1da   : > { %1647 = vrot.lane.b32.xlu1 %v1312_v15, %s3420_s7  ;;  %v1250_v15 = vld [vmem:[#allocation3 + $0x114] ss:$2 sm:$0xff] }
 0x1db   : > { %1789 = vrot.lane.b32.xlu0 %v4062_v21, %s3422_s14 }
 0x1dc   : > { %v1892_v26 = vpop.permute.xlu1 %1891 }
 0x1dd   : > { %v1774_v28 = vpop.permute.xlu0 %1773 }
 0x1de   : > { %1905 = vrot.lane.b32.xlu1 %v1246_v33, %s3424_s17  ;;  %v2037_v35 = vsel %vm2033_vm10, %v2018_v31, %v1774_v28 }
 0x1df   : > { %1848 = vrot.lane.b32.xlu0 %v4073_v34, %s3423_s16 }
 0x1e0   : > { %v4082_v18 = vpop.permute.xlu1 %1563 }
 0x1e1   : > { %v1833_v37 = vpop.permute.xlu0 %1832 }
 0x1e2   : > { %v2056_v59 = vsel %vm2052_vm11, %v2037_v35, %v1833_v37  ;;  %1719 = vrot.lane.b32.xlu1 %v1348_v41, %s3421_s8  ;;  %v1282_v37 = vld [vmem:[#allocation3 + $0x118] ss:$2 sm:$0xff] }
 0x1e3   : > { %1649 = vrot.lane.b32.xlu0 %v1314_v44, %s3420_s7  ;;  %v2075_v19 = vsel %vm2071_vm12, %v2056_v59, %v1892_v26  ;;  %v1280_v59 = vld [vmem:[#allocation3 + $0x108] ss:$2 sm:$0xff] }
 0x1e4   : > { %3142 = vmatmul.mubr.msk.f32.gmra.mrb[8].mxu1 %vm2102_vm13, %v2075_v19  ;;  %v4089_v30 = vpop.permute.xlu1 %1495  ;;  %v1316_v19 = vld [vmem:[#allocation3 + $0x10a] ss:$2 sm:$0xff] }
 0x1e5   : > { %v1706_v45 = vpop.permute.xlu0 %1705 }
 0x1e6   : > { %1721 = vrot.lane.b32.xlu1 %v1350_v46, %s3421_s8 }
 0x1e7   : > { %1907 = vrot.lane.b32.xlu0 %v4091_v43, %s3424_s17 }
 0x1e8   : > { %v1776_v47 = vpop.permute.xlu1 %1775 }
 0x1e9   : > { %v4096_v54 = vpop.permute.xlu0 %1423  ;;  %v2038_v16 = vsel %vm2033_vm10, %v2019_v42, %v1776_v47 }
 0x1ea   : > { %1793 = vrot.lane.b32.xlu1 %v1360_v56, %s3422_s14 }
 0x1eb   : > { %1791 = vrot.lane.b32.xlu0 %v4098_v58, %s3422_s14 }
 0x1ec   : > { %v1835_v63 = vpop.permute.xlu1 %1834 }
 0x1ed   : > { %v4105_v24 = vpop.permute.xlu0 %1565  ;;  %v2057_v22 = vsel %vm2052_vm11, %v2038_v16, %v1835_v63  ;;  %v1378_v63 = vld [vmem:[#allocation3 + $0x162] ss:$2 sm:$0xff] }
 0x1ee   : > { %1852 = vrot.lane.b32.xlu1 %v1370_v5, %s3423_s16 }
 0x1ef   : > { %1850 = vrot.lane.b32.xlu0 %v1214_v38, %s3423_s16 }
 0x1f0   : > { %v4115_v2 = vpop.permute.xlu1 %1635 }
 0x1f1   : > { %v4117_v8 = vpop.permute.xlu0 %1707 }
 0x1f2   : > { %1911 = vrot.lane.b32.xlu1 %v1380_v10, %s3424_s17  ;;  %v1284_v10 = vld [vmem:[#allocation3 + $0x128] ss:$2 sm:$0xff] }
 0x1f3   : > { %1909 = vrot.lane.b32.xlu0 %v1250_v15, %s3424_s17 }
 0x1f4   : > { %v1894_v23 = vpop.permute.xlu1 %1893 }
 0x1f5   : > { %v1426_v25 = vpop.permute.xlu0 %1425  ;;  %v2076_v0 = vsel %vm2071_vm12, %v2057_v22, %v1894_v23  ;;  %v1362_v22 = vld [vmem:[#allocation3 + $0x130] ss:$2 sm:$0xff] }
 0x1f6   : > { %1437 = vrot.lane.b32.xlu1 %v4052_v9, %s3418_s5  ;;  %3144 = vmatprep.mubr.msk.f32.mxu1 %vm2102_vm13, %v2076_v0  ;;  %v1948_v1 = vsel %vm670_vm4, %v3873_v17, %v1426_v25  ;;  %v3351_v9 = vld [vmem:[#allocation3 + $0x50] ss:$2 sm:$0xff] }
 0x1f7   : > { %1435 = vrot.lane.b32.xlu0 %v4027_v62, %s3418_s5  ;;  %v1944_v62 = vsel %vm670_vm4, %v3351_v9, %v3971_v11  ;;  %v1318_v23 = vld [vmem:[#allocation3 + $0x11a] ss:$2 sm:$0xff] }
 0x1f8   : > { %v4133_v26 = vpop.permute.xlu1 %1637  ;;  %v1963_v36 = vsel %vm1957_vm6, %v1944_v62, %v3983_v20  ;;  %v1372_v0 = vld [vmem:[#allocation3 + $0x132] ss:$2 sm:$0xff] }
 0x1f9   : > { %v1498_v28 = vpop.permute.xlu0 %1497  ;;  %v1982_v35 = vsel %vm1976_vm7, %v1963_v36, %v4023_v57 }
 0x1fa   : > { %v4136_v32 = vsel %vm1957_vm6, %v1948_v1, %v1498_v28  ;;  %1509 = vrot.lane.b32.xlu1 %v1246_v33, %s3417_s4  ;;  %v2001_v33 = vsel %vm1995_vm8, %v1982_v35, %v4058_v3  ;;  %v1354_v1 = vld [vmem:[#allocation3 + $0x11c] ss:$2 sm:$0xff]  ;;  %v1946_v28 = vsel %vm670_vm4, %v3824_v7, %v4049_v6 }
 0x1fb   : > { %1507 = vrot.lane.b32.xlu0 %v4013_v49, %s3417_s4  ;;  %v2020_v49 = vsel %vm2014_vm9, %v2001_v33, %v1706_v45  ;;  %v1352_v45 = vld [vmem:[#allocation3 + $0x10c] ss:$2 sm:$0xff]  ;;  %v1965_v9 = vsel %vm1957_vm6, %v1946_v28, %v4060_v13 }
 0x1fc   : > { %v1896_v31 = vpop.permute.xlu1 %1895  ;;  %v1364_v35 = vld [vmem:[#allocation3 + $0x140] ss:$2 sm:$0xff] }
 0x1fd   : > { %v1778_v17 = vpop.permute.xlu0 %1777 }
 0x1fe   : > { %1581 = vrot.lane.b32.xlu1 %v1282_v37, %s3419_s6  ;;  %v2039_v11 = vsel %vm2033_vm10, %v2020_v49, %v1778_v17  ;;  %v1320_v17 = vld [vmem:[#allocation3 + $0x12a] ss:$2 sm:$0xff] }
 0x1ff   : > { %1579 = vrot.lane.b32.xlu0 %v1280_v59, %s3419_s6  ;;  %v1382_v49 = vld [vmem:[#allocation3 + $0x134] ss:$2 sm:$0xff] }
 0x200   : > { %v4153_v41 = vpop.permute.xlu1 %1567 }
 0x201   : > { %v1837_v20 = vpop.permute.xlu0 %1836 }
 0x202   : > { %v2058_v44 = vsel %vm2052_vm11, %v2039_v11, %v1837_v20  ;;  %1439 = vrot.lane.b32.xlu1 %v4073_v34, %s3418_s5  ;;  %v1945_v34 = vsel %vm670_vm4, %v3800_v39, %v4011_v48  ;;  %v1388_v48 = vld [vmem:[#allocation3 + $0x164] ss:$2 sm:$0xff] }
 0x203   : > { %1651 = vrot.lane.b32.xlu0 %v1316_v19, %s3420_s7  ;;  %v2077_v57 = vsel %vm2071_vm12, %v2058_v44, %v1896_v31  ;;  %v1984_v31 = vsel %vm1976_vm7, %v1965_v9, %v4105_v24  ;;  %v1286_v11 = vld [vmem:[#allocation3 + $0x138] ss:$2 sm:$0xff] }
 0x204   : > { %3145 = vmatmul.mubr.msk.f32.gmra.mrb[10].mxu1 %vm2102_vm13, %v2077_v57  ;;  %v1500_v3 = vpop.permute.xlu1 %1499  ;;  %v2003_v37 = vsel %vm1995_vm8, %v1984_v31, %v4133_v26  ;;  %v1356_v44 = vld [vmem:[#allocation3 + $0x12c] ss:$2 sm:$0xff] }
 0x205   : > { %v1710_v46 = vpop.permute.xlu0 %1709  ;;  %v1374_v19 = vld [vmem:[#allocation3 + $0x142] ss:$2 sm:$0xff] }
 0x206   : > { %1723 = vrot.lane.b32.xlu1 %v1352_v45, %s3421_s8  ;;  %v2022_v59 = vsel %vm2014_vm9, %v2003_v37, %v1710_v46  ;;  %v1358_v46 = vld [vmem:[#allocation3 + $0x13c] ss:$2 sm:$0xff] }
 0x207   : > { %1441 = vrot.lane.b32.xlu0 %v1214_v38, %s3418_s5  ;;  %v1322_v45 = vld [vmem:[#allocation3 + $0x13a] ss:$2 sm:$0xff] }
 0x208   : > { %v1780_v47 = vpop.permute.xlu1 %1779 }
 0x209   : > { %v1428_v55 = vpop.permute.xlu0 %1427 }
 0x20a   : > { %v1949_v56 = vsel %vm670_vm4, %v3898_v12, %v1428_v55  ;;  %1511 = vrot.lane.b32.xlu1 %v4091_v43, %s3417_s4  ;;  %v1964_v12 = vsel %vm1957_vm6, %v1945_v34, %v4007_v40  ;;  %v1376_v55 = vld [vmem:[#allocation3 + $0x152] ss:$2 sm:$0xff] }
 0x20b   : > { %1513 = vrot.lane.b32.xlu0 %v1250_v15, %s3417_s4  ;;  %v4172_v61 = vsel %vm1957_vm6, %v1949_v56, %v1500_v3  ;;  %v1983_v53 = vsel %vm1976_vm7, %v1964_v12, %v4082_v18 }
 0x20c   : > { %v1839_v5 = vpop.permute.xlu1 %1838  ;;  %v2002_v39 = vsel %vm1995_vm8, %v1983_v53, %v4115_v2 }
 0x20d   : > { %v4174_v38 = vpop.permute.xlu0 %1569  ;;  %v2021_v15 = vsel %vm2014_vm9, %v2002_v39, %v4117_v8 }
 0x20e   : > { %1860 = vrot.lane.b32.xlu1 %v1378_v63, %s3423_s16  ;;  %v2040_v40 = vsel %vm2033_vm10, %v2021_v15, %v1780_v47  ;;  %v1947_v47 = vsel %vm670_vm4, %v3858_v60, %v4096_v54  ;;  %v1366_v54 = vld [vmem:[#allocation3 + $0x150] ss:$2 sm:$0xff] }
 0x20f   : > { %1801 = vrot.lane.b32.xlu0 %v1368_v27, %s3422_s14  ;;  %v2059_v18 = vsel %vm2052_vm11, %v2040_v40, %v1839_v5  ;;  %v1966_v63 = vsel %vm1957_vm6, %v1947_v47, %v4089_v30  ;;  %v1384_v27 = vld [vmem:[#allocation3 + $0x144] ss:$2 sm:$0xff] }
 0x210   : > { %v4184_v43 = vpop.permute.xlu1 %1639  ;;  %v1985_v5 = vsel %vm1976_vm7, %v1966_v63, %v4153_v41 }
 0x211   : > { %v4186_v50 = vpop.permute.xlu0 %1711  ;;  %v2004_v60 = vsel %vm1995_vm8, %v1985_v5, %v4184_v43 }
 0x212   : > { %1583 = vrot.lane.b32.xlu1 %v1284_v10, %s3419_s6  ;;  %v2023_v39 = vsel %vm2014_vm9, %v2004_v60, %v4186_v50  ;;  %v1986_v50 = vsel %vm1976_vm7, %v4136_v32, %v4174_v38 }
 0x213   : > { %1919 = vrot.lane.b32.xlu0 %v1388_v48, %s3424_s17  ;;  %v1386_v48 = vld [vmem:[#allocation3 + $0x154] ss:$2 sm:$0xff] }
 0x214   : > { %v1898_v42 = vpop.permute.xlu1 %1897 }
 0x215   : > { %v4194_v16 = vpop.permute.xlu0 %1429  ;;  %v2078_v2 = vsel %vm2071_vm12, %v2059_v18, %v1898_v42 }
 0x216   : > { %1795 = vrot.lane.b32.xlu1 %v1362_v22, %s3422_s14  ;;  %3147 = vmatprep.mubr.msk.f32.mxu1 %vm2102_vm13, %v2078_v2 }
 0x217   : > { %1653 = vrot.lane.b32.xlu0 %v1318_v23, %s3420_s7 }
 0x218   : > { %v4200_v8 = vpop.permute.xlu1 %1641 }
 0x219   : > { %v4202_v25 = vpop.permute.xlu0 %1501  ;;  %v2005_v22 = vsel %vm1995_vm8, %v1986_v50, %v4200_v8 }
 0x21a   : > { %1854 = vrot.lane.b32.xlu1 %v1372_v0, %s3423_s16 }
 0x21b   : > { %1725 = vrot.lane.b32.xlu0 %v1354_v1, %s3421_s8 }
 0x21c   : > { %v1900_v62 = vpop.permute.xlu1 %1899 }
 0x21d   : > { %v1782_v36 = vpop.permute.xlu0 %1781 }
 0x21e   : > { %1655 = vrot.lane.b32.xlu1 %v1320_v17, %s3420_s7  ;;  %v2041_v7 = vsel %vm2033_vm10, %v2022_v59, %v1782_v36 }
 0x21f   : > { %1797 = vrot.lane.b32.xlu0 %v1364_v35, %s3422_s14 }
 0x220   : > { %v1572_v6 = vpop.permute.xlu1 %1571 }
 0x221   : > { %v1841_v13 = vpop.permute.xlu0 %1840  ;;  %v1987_v32 = vsel %vm1976_vm7, %v4172_v61, %v1572_v6 }
 0x222   : > { %v2060_v33 = vsel %vm2052_vm11, %v2041_v7, %v1841_v13  ;;  %1913 = vrot.lane.b32.xlu1 %v1382_v49, %s3424_s17 }
 0x223   : > { %1585 = vrot.lane.b32.xlu0 %v1286_v11, %s3419_s6  ;;  %v2079_v24 = vsel %vm2071_vm12, %v2060_v33, %v1900_v62  ;;  %s3426_s6 = smov 60  }
 0x224   : > { %3148 = vmatmul.mubr.msk.f32.gmra.mrb[12].mxu1 %vm2102_vm13, %v2079_v24  ;;  %v4224_v26 = vpop.permute.xlu1 %1503  ;;  %v1950_v24 = vsel %vm670_vm4, %v3918_v29, %v4194_v16 }
 0x225   : > { %v1714_v20 = vpop.permute.xlu0 %1713  ;;  %v1969_v61 = vsel %vm1957_vm6, %v1950_v24, %v4202_v25 }
 0x226   : > { %1727 = vrot.lane.b32.xlu1 %v1356_v44, %s3421_s8  ;;  %v2024_v23 = vsel %vm2014_vm9, %v2005_v22, %v1714_v20 }
 0x227   : > { %1856 = vrot.lane.b32.xlu0 %v1374_v19, %s3423_s16 }
 0x228   : > { %v1784_v57 = vpop.permute.xlu1 %1783 }
 0x229   : > { %v4228_v3 = vpop.permute.xlu0 %1431  ;;  %v2042_v30 = vsel %vm2033_vm10, %v2023_v39, %v1784_v57 }
 0x22a   : > { %1729 = vrot.lane.b32.xlu1 %v1358_v46, %s3421_s8  ;;  %v1951_v16 = vsel %vm670_vm4, %v3947_v52, %v4228_v3  ;;  %s3352_s8 = scalar_lea.vmem %s4520_s25, 16 }
 0x22b   : > { %1657 = vrot.lane.b32.xlu0 %v1322_v45, %s3420_s7  ;;  %p3353_p11 = scmp.ne.s32.totalorder %s4520_s25, %s3352_s8 }
 0x22c   : > { %v1843_v56 = vpop.permute.xlu1 %1842 }
 0x22d   : > { %v1574_v34 = vpop.permute.xlu0 %1573  ;;  %v2061_v41 = vsel %vm2052_vm11, %v2042_v30, %v1843_v56  ;;  %p3354_p12 = pnand %p3353_p11, %p3486_p5 }
 0x22e   : > { %1858 = vrot.lane.b32.xlu1 %v1376_v55, %s3423_s16  ;;  %v1988_v6 = vsel %vm1976_vm7, %v1969_v61, %v1574_v34 }
 0x22f   : > { %1915 = vrot.lane.b32.xlu0 %v1384_v27, %s3424_s17  ;;  %v1970_v27 = vsel %vm1957_vm6, %v1951_v16, %v4224_v26  ;;  %p3355_p13 = pneg %p3354_p12 }
 0x230   : > { %v1644_v12 = vpop.permute.xlu1 %1643 }
 0x231   : > { %v1716_v53 = vpop.permute.xlu0 %1715  ;;  %v2006_v38 = vsel %vm1995_vm8, %v1987_v32, %v1644_v12 }
 0x232   : > { %v2025_v59 = vsel %vm2014_vm9, %v2006_v38, %v1716_v53 }
 0x233   : > { %1799 = vrot.lane.b32.xlu0 %v1366_v54, %s3422_s14 }
 0x234   : > { %v1902_v10 = vpop.permute.xlu1 %1901 }
 0x235   : > { %v1434_v15 = vpop.permute.xlu0 %1433  ;;  %v2080_v40 = vsel %vm2071_vm12, %v2061_v41, %v1902_v10 }
 0x236   : > { %3150 = vmatprep.mubr.msk.f32.mxu1 %vm2102_vm13, %v2080_v40  ;;  %v1952_v34 = vsel %vm670_vm4, %v3975_v14, %v1434_v15 }
 0x237   : > { %1917 = vrot.lane.b32.xlu0 %v1386_v48, %s3424_s17 }
 0x238   : > { %v1646_v43 = vpop.permute.xlu1 %1645 }
 0x239   : > { %v1506_v18 = vpop.permute.xlu0 %1505  ;;  %v2007_v19 = vsel %vm1995_vm8, %v1988_v6, %v1646_v43 }
 0x23a   : > { %v1971_v63 = vsel %vm1957_vm6, %v1952_v34, %v1506_v18 }
 0x23c   : > { %v1904_v42 = vpop.permute.xlu1 %1903 }
 0x23d   : > { %v1786_v2 = vpop.permute.xlu0 %1785 }
 0x23e   : > { %v2043_v0 = vsel %vm2033_vm10, %v2024_v23, %v1786_v2 }
 0x240   : > { %v1576_v1 = vpop.permute.xlu1 %1575 }
 0x241   : > { %v1845_v28 = vpop.permute.xlu0 %1844  ;;  %v1989_v5 = vsel %vm1976_vm7, %v1970_v27, %v1576_v1 }
 0x242   : > { %v2062_v9 = vsel %vm2052_vm11, %v2043_v0, %v1845_v28 }
 0x243   : > { %v2081_v62 = vsel %vm2071_vm12, %v2062_v9, %v1904_v42 }
 0x244   : > { %3151 = vmatmul.mubr.msk.f32.gmra.mrb[14].mxu1 %vm2102_vm13, %v2081_v62  ;;  %v1788_v36 = vpop.permute.xlu1 %1787 }
 0x245   : > { %v1718_v31 = vpop.permute.xlu0 %1717  ;;  %v2044_v7 = vsel %vm2033_vm10, %v2025_v59, %v1788_v36 }
 0x246   : > { %v2026_v57 = vsel %vm2014_vm9, %v2007_v19, %v1718_v31 }
 0x248   : > { %v1847_v17 = vpop.permute.xlu1 %1846 }
 0x249   : > { %v1578_v35 = vpop.permute.xlu0 %1577  ;;  %v2063_v13 = vsel %vm2052_vm11, %v2044_v7, %v1847_v17 }
 0x24a   : > { %v1990_v60 = vsel %vm1976_vm7, %v1971_v63, %v1578_v35 }
 0x24c   : > { %v1648_v8 = vpop.permute.xlu1 %1647 }
 0x24d   : > { %v1790_v37 = vpop.permute.xlu0 %1789  ;;  %v2008_v53 = vsel %vm1995_vm8, %v1989_v5, %v1648_v8 }
 0x24e   : > { %v2045_v46 = vsel %vm2033_vm10, %v2026_v57, %v1790_v37 }
 0x250   : > { %v1906_v33 = vpop.permute.xlu1 %1905 }
 0x251   : > { %v1849_v49 = vpop.permute.xlu0 %1848  ;;  %v2082_v11 = vsel %vm2071_vm12, %v2063_v13, %v1906_v33 }
 0x252   : > { %3153 = vmatprep.mubr.msk.f32.mxu1 %vm2102_vm13, %v2082_v11  ;;  %v2064_v45 = vsel %vm2052_vm11, %v2045_v46, %v1849_v49 }
 0x254   : > { %v1720_v20 = vpop.permute.xlu1 %1719 }
 0x255   : > { %v1650_v44 = vpop.permute.xlu0 %1649  ;;  %v2027_v3 = vsel %vm2014_vm9, %v2008_v53, %v1720_v20 }
 0x256   : > { %v2009_v52 = vsel %vm1995_vm8, %v1990_v60, %v1650_v44 }
 0x258   : > { %v1722_v47 = vpop.permute.xlu1 %1721 }
 0x259   : > { %v1908_v55 = vpop.permute.xlu0 %1907  ;;  %v2028_v39 = vsel %vm2014_vm9, %v2009_v52, %v1722_v47 }
 0x25a   : > { %v2083_v29 = vsel %vm2071_vm12, %v2064_v45, %v1908_v55 }
 0x25b   : > { %3154 = vmatmul.mubr.msk.f32.gmra.mrb[16].mxu1 %vm2102_vm13, %v2083_v29 }
 0x25c   : > { %v1794_v25 = vpop.permute.xlu1 %1793 }
 0x25d   : > { %v1792_v56 = vpop.permute.xlu0 %1791  ;;  %v2047_v14 = vsel %vm2033_vm10, %v2028_v39, %v1794_v25 }
 0x25e   : > { %v2046_v30 = vsel %vm2033_vm10, %v2027_v3, %v1792_v56 }
 0x260   : > { %v1853_v54 = vpop.permute.xlu1 %1852 }
 0x261   : > { %v1851_v12 = vpop.permute.xlu0 %1850  ;;  %v2066_v26 = vsel %vm2052_vm11, %v2047_v14, %v1853_v54 }
 0x262   : > { %v2065_v48 = vsel %vm2052_vm11, %v2046_v30, %v1851_v12 }
 0x264   : > { %v1912_v41 = vpop.permute.xlu1 %1911 }
 0x265   : > { %v1910_v10 = vpop.permute.xlu0 %1909  ;;  %v2085_v15 = vsel %vm2071_vm12, %v2066_v26, %v1912_v41 }
 0x266   : > { %v2084_v40 = vsel %vm2071_vm12, %v2065_v48, %v1910_v10 }
 0x267   : > { %3156 = vmatprep.mubr.msk.f32.mxu1 %vm2102_vm13, %v2084_v40 }
 0x268   : > { %3157 = vmatmul.mubr.msk.f32.gmra.mrb[18].mxu1 %vm2102_vm13, %v2085_v15  ;;  %v1438_v43 = vpop.permute.xlu1 %1437 }
 0x269   : > { %v1436_v18 = vpop.permute.xlu0 %1435  ;;  %v1954_v16 = vsel %vm670_vm4, %v4040_v4, %v1438_v43 }
 0x26a   : > { %v1953_v59 = vsel %vm670_vm4, %v4015_v51, %v1436_v18  ;;  %v4314_v51 = vld [vmem:[%s4561_s1 + $0x131] ss:$0 sm:$0xff] }
 0x26c   : > { %v1510_v42 = vpop.permute.xlu1 %1509 }
 0x26d   : > { %v1508_v2 = vpop.permute.xlu0 %1507  ;;  %v1973_v25 = vsel %vm1957_vm6, %v1954_v16, %v1510_v42 }
 0x26e   : > { %v1972_v7 = vsel %vm1957_vm6, %v1953_v59, %v1508_v2 }
 0x270   : > { %v1582_v50 = vpop.permute.xlu1 %1581 }
 0x271   : > { %v1580_v22 = vpop.permute.xlu0 %1579  ;;  %v1992_v34 = vsel %vm1976_vm7, %v1973_v25, %v1582_v50  ;;  %v2522_v25 = vld [vmem:[%s4561_s1 + $0x48] sm:$0xff] }
 0x272   : > { %v1991_v13 = vsel %vm1976_vm7, %v1972_v7, %v1580_v22 }
 0x274   : > { %v1440_v23 = vpop.permute.xlu1 %1439 }
 0x275   : > { %v1652_v0 = vpop.permute.xlu0 %1651  ;;  %v1955_v52 = vsel %vm670_vm4, %v4062_v21, %v1440_v23 }
 0x276   : > { %v2010_v11 = vsel %vm1995_vm8, %v1991_v13, %v1652_v0 }
 0x278   : > { %v1724_v1 = vpop.permute.xlu1 %1723 }
 0x279   : > { %v1442_v28 = vpop.permute.xlu0 %1441  ;;  %v2029_v24 = vsel %vm2014_vm9, %v2010_v11, %v1724_v1 }
 0x27a   : > { %v1956_v56 = vsel %vm670_vm4, %v4098_v58, %v1442_v28  ;;  %vm2520_vm4 = vcmask 785408  }
 0x27c   : > { %v1512_v9 = vpop.permute.xlu1 %1511 }
 0x27d   : > { %v1514_v62 = vpop.permute.xlu0 %1513  ;;  %v1974_v39 = vsel %vm1957_vm6, %v1955_v52, %v1512_v9 }
 0x27e   : > { %v1975_v63 = vsel %vm1957_vm6, %v1956_v56, %v1514_v62  ;;  %v2523_v56 = vld [vmem:[%s4561_s1 + $0x50] sm:$0xff] }
 0x280   : > { %v1861_v36 = vpop.permute.xlu1 %1860 }
 0x281   : > { %v1802_v31 = vpop.permute.xlu0 %1801 }
 0x284   : > { %v1584_v17 = vpop.permute.xlu1 %1583 }
 0x285   : > { %v1920_v35 = vpop.permute.xlu0 %1919  ;;  %v1993_v26 = vsel %vm1976_vm7, %v1974_v39, %v1584_v17  ;;  %v2528_v39 = vld [vmem:[%s4561_s1 + $0x78] sm:$0xff] }
 0x288   : > { %v1796_v32 = vpop.permute.xlu1 %1795 }
 0x289   : > { %v1654_v38 = vpop.permute.xlu0 %1653  ;;  %v2048_v61 = vsel %vm2033_vm10, %v2029_v24, %v1796_v32 }
 0x28a   : > { %v2011_v5 = vsel %vm1995_vm8, %v1992_v34, %v1654_v38  ;;  %v2524_v34 = vld [vmem:[%s4561_s1 + $0x58] sm:$0xff] }
 0x28c   : > { %v1855_v8 = vpop.permute.xlu1 %1854 }
 0x28d   : > { %v1726_v37 = vpop.permute.xlu0 %1725  ;;  %v2067_v6 = vsel %vm2052_vm11, %v2048_v61, %v1855_v8 }
 0x28e   : > { %v2030_v54 = vsel %vm2014_vm9, %v2011_v5, %v1726_v37  ;;  %v2525_v5 = vld [vmem:[%s4561_s1 + $0x60] sm:$0xff] }
 0x290   : > { %v1656_v33 = vpop.permute.xlu1 %1655 }
 0x291   : > { %v1798_v49 = vpop.permute.xlu0 %1797  ;;  %v2012_v48 = vsel %vm1995_vm8, %v1993_v26, %v1656_v33  ;;  %v2529_v26 = vld [vmem:[%s4561_s1 + $0x80] sm:$0xff] }
 0x292   : > { %v2049_v53 = vsel %vm2033_vm10, %v2030_v54, %v1798_v49  ;;  %v2526_v54 = vld [vmem:[%s4561_s1 + $0x68] sm:$0xff] }
 0x294   : > { %v1914_v20 = vpop.permute.xlu1 %1913 }
 0x295   : > { %v1586_v44 = vpop.permute.xlu0 %1585  ;;  %v2086_v19 = vsel %vm2071_vm12, %v2067_v6, %v1914_v20 }
 0x296   : > { %3159 = vmatprep.mubr.msk.f32.mxu1 %vm2102_vm13, %v2086_v19  ;;  %v1994_v60 = vsel %vm1976_vm7, %v1975_v63, %v1586_v44  ;;  %v3425_v63 = vmov 0.0|0.0   ;;  %vm2708_vm7 = vcmask 326656  }
 0x297   : > { %v3140_v57 = vpop.f32.mrb[6].mxu1  ;;  %3250 = vmatprep.subr.bf16.mxu1 %v3425_v63 }
 0x298   : > { %v2233_v46 = vadd.f32 %v3140_v57, %v4314_v51  ;;  %v2227_v45 = vpop.f32.mrb[7].mxu1  ;;  %v1728_v55 = vpop.permute.xlu1 %1727 }
 0x299   : > { %v2228_v47 = vadd.f32 %v4314_v51, %v2227_v45  ;;  %v1857_v29 = vpop.permute.xlu0 %1856  ;;  %v2031_v41 = vsel %vm2014_vm9, %v2012_v48, %v1728_v55  ;;  %v3260_v48 = vpack.c.bf16 %v2529_v26, %v2528_v39  ;;  %v2621_v39 = vld [vmem:[%s4561_s1 + $0xe0] sm:$0xff]  ;;  %v2623_v26 = vld [vmem:[%s4561_s1 + $0xf0] sm:$0xff] }
 0x29a   : > { %2317 = vst.msk [vmem:[#allocation4 + $0x8] sm:$0xff] %vm1957_vm6, %v2233_v46  ;;  %v2068_v58 = vsel %vm2052_vm11, %v2049_v53, %v1857_v29 }
 0x29b   : > { %2316 = vst.msk [vmem:[#allocation4] sm:$0xff] %vm1957_vm6, %v2228_v47 }
 0x29c   : > { %v1730_v12 = vpop.permute.xlu1 %1729 }
 0x29d   : > { %v1658_v27 = vpop.permute.xlu0 %1657 }
 0x29e   : > { %v2013_v4 = vsel %vm1995_vm8, %v1994_v60, %v1658_v27  ;;  %v3251_v27 = vpack.c.bf16 %v2523_v56, %v2522_v25  ;;  %v3254_v60 = vpack.c.bf16 %v2525_v5, %v2524_v34  ;;  %v2616_v56 = vld [vmem:[%s4561_s1 + $0xb8] sm:$0xff]  ;;  %v2617_v34 = vld [vmem:[%s4561_s1 + $0xc0] sm:$0xff] }
 0x29f   : > { %v2032_v14 = vsel %vm2014_vm9, %v2013_v4, %v1730_v12  ;;  %v2527_v12 = vld [vmem:[%s4561_s1 + $0x70] sm:$0xff] }
 0x2a0   : > { %v2051_v10 = vsel %vm2033_vm10, %v2032_v14, %v1802_v31  ;;  %v1859_v40 = vpop.permute.xlu1 %1858  ;;  %3252 = vmatpush3.bf16.msra.mxu1 %v3251_v27 }
 0x2a1   : > { %v1916_v3 = vpop.permute.xlu0 %1915  ;;  %v2070_v43 = vsel %vm2052_vm11, %v2051_v10, %v1861_v36  ;;  %3253 = vmatprep.subr.bf16.mxu1 %v3425_v63  ;;  %v2530_v10 = vld [vmem:[%s4561_s1 + $0x88] sm:$0xff] }
 0x2a2   : > { %v2087_v30 = vsel %vm2071_vm12, %v2068_v58, %v1916_v3  ;;  %v2089_v50 = vsel %vm2071_vm12, %v2070_v43, %v1920_v35  ;;  %v2334_v28 = vld [vmem:[#allocation4] sm:$0xff]  ;;  %v3257_v3 = vpack.c.bf16 %v2527_v12, %v2526_v54  ;;  %v2533_v43 = vld [vmem:[%s4561_s1 + $0xa0] sm:$0xff] }
 0x2a3   : > { %3160 = vmatmul.mubr.msk.f32.gmra.mrb[20].mxu1 %vm2102_vm13, %v2087_v30  ;;  %v2349_v9 = vld [vmem:[#allocation4 + $0x1] sm:$0xff] }
 0x2a4   : > { %v2364_v31 = vmax.f32 %v2334_v28, %v2349_v9  ;;  %3255 = vmatpush3.bf16.msra.mxu1 %v3254_v60  ;;  %v3273_v60 = vpack.c.bf16 %v2617_v34, %v2616_v56 }
 0x2a5   : > { %v1800_v21 = vpop.permute.xlu0 %1799  ;;  %3256 = vmatprep.subr.bf16.mxu1 %v3425_v63 }
 0x2a6   : > { %v2050_v15 = vsel %vm2033_vm10, %v2031_v41, %v1800_v21  ;;  %v2531_v21 = vld [vmem:[%s4561_s1 + $0x90] sm:$0xff] }
 0x2a7   : > { %v2069_v18 = vsel %vm2052_vm11, %v2050_v15, %v1859_v40  ;;  %v3263_v15 = vpack.c.bf16 %v2531_v21, %v2530_v10  ;;  %v2532_v40 = vld [vmem:[%s4561_s1 + $0x98] sm:$0xff]  ;;  %v2625_v10 = vld [vmem:[%s4561_s1 + $0x100] sm:$0xff] }
 0x2a8   : > { %3258 = vmatpush3.bf16.msra.mxu1 %v3257_v3  ;;  %v2620_v3 = vld [vmem:[%s4561_s1 + $0xd8] sm:$0xff] }
 0x2a9   : > { %v1918_v42 = vpop.permute.xlu0 %1917  ;;  %3259 = vmatprep.subr.bf16.mxu1 %v3425_v63 }
 0x2aa   : > { %v2088_v2 = vsel %vm2071_vm12, %v2069_v18, %v1918_v42 }
 0x2ab   : > { %3162 = vmatprep.mubr.msk.f32.mxu1 %vm2102_vm13, %v2088_v2 }
 0x2ac   : > { %3163 = vmatmul.mubr.msk.f32.gmra.mrb[22].mxu1 %vm2102_vm13, %v2089_v50  ;;  %v3266_v50 = vpack.c.bf16 %v2533_v43, %v2532_v40  ;;  %v2702_v40 = vld [vmem:[%s4561_s1 + $0x108] sm:$0xff]  ;;  %v2703_v43 = vld [vmem:[%s4561_s1 + $0x110] sm:$0xff] }
 0x2ad   : > { %3261 = vmatpush3.bf16.msra.mxu1 %v3260_v48 }
 0x2ae   : > { %3262 = vmatprep.subr.bf16.mxu1 %v3425_v63 }
 0x2b1   : > { %3264 = vmatpush3.bf16.msra.mxu1 %v3263_v15  ;;  %v2536_v15 = vld [vmem:[%s4561_s1 + $0x132] sm:$0x1] }
 0x2b2   : > { %3265 = vmatprep.subr.bf16.mxu1 %v3425_v63 }
 0x2b5   : > { %3267 = vmatpush3.bf16.msra.mxu1 %v3266_v50  ;;  %v3288_v50 = vpack.c.bf16 %v2703_v43, %v2702_v40 }
 0x2b6   : > { %3268 = vmatprep.subr.bf16.mxu1 %v3425_v63 }
 0x2b7   : > { %v3143_v22 = vpop.f32.mrb[8].mxu1 }
 0x2b8   : > { %v2243_v23 = vadd.f32 %v3143_v22, %v4314_v51  ;;  %v2237_v0 = vpop.f32.mrb[9].mxu1 }
 0x2b9   : > { %v2238_v1 = vadd.f32 %v4314_v51, %v2237_v0 }
 0x2ba   : > { %2319 = vst.msk [vmem:[#allocation4 + $0x18] sm:$0xff] %vm1957_vm6, %v2243_v23 }
 0x2bb   : > { %2318 = vst.msk [vmem:[#allocation4 + $0x10] sm:$0xff] %vm1957_vm6, %v2238_v1 }
 0x2c2   : > { %v2379_v62 = vld [vmem:[#allocation4 + $0x14] sm:$0xff] }
 0x2c3   : > { %v2394_v36 = vld [vmem:[#allocation4 + $0x15] sm:$0xff] }
 0x2c4   : > { %v2409_v17 = vmax.f32 %v2379_v62, %v2394_v36  ;;  %v2534_v36 = vld [vmem:[%s4561_s1 + $0xa8] sm:$0xff] }
 0x2c6   : > { %v2424_v32 = vmax.f32 %v2364_v31, %v2409_v17  ;;  %v2535_v31 = vld [vmem:[%s4561_s1 + $0xb0] sm:$0xf] }
 0x2c8   : > { %v2439_v35 = vmax.f32 %v2424_v32, 0.0  ;;  %v3269_v32 = vpack.c.bf16 %v2535_v31, %v2534_v36 }
 0x2ca   : > { %2454 = vst.msk [vmem:[#allocation5] sm:$0xff] %vm1957_vm6, %v2439_v35  ;;  %3271 = vmatpush3.bf16.msk.msra.mxu1 %vm3270_vm15, %v3269_v32 }
 0x2cb   : > { %3272 = vmatprep.subr.bf16.mxu1 %v3425_v63 }
 0x2d1   : > { %v2471_v38 = vld [vmem:[#allocation5 + $0x4] sm:$0x1]  ;;  %v2470_v8 = vld [vmem:[#allocation5 + $0x2] sm:$0x1] }
 0x2d2   : > { %2483 = vrot.lane.b32.xlu0 %v2471_v38, %s3420_s7  ;;  %2479 = vrot.lane.b32.xlu1 %v2470_v8, %s3417_s4  ;;  %v3428_v38 = vmov 0.0   ;;  %s2785_s7 = scalar_lea.sflag [#allocation7], %s135_s3 }
 0x2d3   : > { %3193 = vmatprep.mubr.msk.f32.mxu1 %vm3427_vm0, %v3428_v38 }
 0x2d7   : > { %v3146_v37 = vpop.f32.mrb[10].mxu1 }
 0x2d8   : > { %v2253_v59 = vadd.f32 %v3146_v37, %v4314_v51  ;;  %v2247_v7 = vpop.f32.mrb[11].mxu1 }
 0x2d9   : > { %v2248_v13 = vadd.f32 %v4314_v51, %v2247_v7 }
 0x2da   : > { %2321 = vst.msk [vmem:[#allocation4 + $0x28] sm:$0xff] %vm1957_vm6, %v2253_v59 }
 0x2db   : > { %2320 = vst.msk [vmem:[#allocation4 + $0x20] sm:$0xff] %vm1957_vm6, %v2248_v13 }
 0x2e1   : > { %v2339_v57 = vld [vmem:[#allocation4 + $0x28] sm:$0xff] }
 0x2f7   : > { %v3149_v33 = vpop.f32.mrb[12].mxu1 }
 0x2f8   : > { %v2263_v49 = vadd.f32 %v3149_v33, %v4314_v51  ;;  %v2257_v11 = vpop.f32.mrb[13].mxu1 }
 0x2f9   : > { %v2258_v24 = vadd.f32 %v4314_v51, %v2257_v11 }
 0x2fa   : > { %2323 = vst.msk [vmem:[#allocation4 + $0x38] sm:$0xff] %vm1957_vm6, %v2263_v49 }
 0x2fb   : > { %2322 = vst.msk [vmem:[#allocation4 + $0x30] sm:$0xff] %vm1957_vm6, %v2258_v24 }
 0x302   : > { %v2354_v19 = vld [vmem:[#allocation4 + $0x29] sm:$0xff] }
 0x303   : > { %v2369_v47 = vmax.f32 %v2339_v57, %v2354_v19  ;;  %v2469_v19 = vld [vmem:[#allocation5] sm:$0x1] }
 0x317   : > { %v3152_v61 = vpop.f32.mrb[14].mxu1 }
 0x318   : > { %v2273_v6 = vadd.f32 %v3152_v61, %v4314_v51  ;;  %v2267_v20 = vpop.f32.mrb[15].mxu1 }
 0x319   : > { %v2268_v44 = vadd.f32 %v4314_v51, %v2267_v20 }
 0x31a   : > { %2325 = vst.msk [vmem:[#allocation4 + $0x48] sm:$0xff] %vm1957_vm6, %v2273_v6 }
 0x31b   : > { %2324 = vst.msk [vmem:[#allocation4 + $0x40] sm:$0xff] %vm1957_vm6, %v2268_v44 }
 0x322   : > { %v2384_v46 = vld [vmem:[#allocation4 + $0x3c] sm:$0xff] }
 0x323   : > { %v2399_v45 = vld [vmem:[#allocation4 + $0x3d] sm:$0xff] }
 0x324   : > { %v2414_v55 = vmax.f32 %v2384_v46, %v2399_v45 }
 0x326   : > { %v2429_v29 = vmax.f32 %v2369_v47, %v2414_v55 }
 0x328   : > { %v2444_v16 = vmax.f32 %v2429_v29, 0.0 }
 0x32a   : > { %2459 = vst.msk [vmem:[#allocation5 + $0x28] sm:$0xff] %vm1957_vm6, %v2444_v16 }
 0x32e   : > { %v3155_v4 = vpop.f32.mrb[16].mxu1 }
 0x32f   : > { %v2283_v53 = vadd.f32 %v3155_v4, %v4314_v51  ;;  %v2277_v52 = vpop.f32.mrb[17].mxu1  ;;  %v2618_v4 = vld [vmem:[%s4561_s1 + $0xc8] sm:$0xff] }
 0x330   : > { %v2278_v58 = vadd.f32 %v4314_v51, %v2277_v52 }
 0x331   : > { %2327 = vst.msk [vmem:[#allocation4 + $0x58] sm:$0xff] %vm1957_vm6, %v2283_v53  ;;  %v2474_v14 = vld [vmem:[#allocation5 + $0x2c] sm:$0x1]  ;;  %v2472_v30 = vld [vmem:[#allocation5 + $0x28] sm:$0x1]  ;;  %v2619_v53 = vld [vmem:[%s4561_s1 + $0xd0] sm:$0xff] }
 0x332   : > { %2326 = vst.msk [vmem:[#allocation4 + $0x50] sm:$0xff] %vm1957_vm6, %v2278_v58  ;;  %2495 = vrot.lane.b32.xlu0 %v2474_v14, %s3426_s6  ;;  %2487 = vrot.lane.b32.xlu1 %v2472_v30, %s3422_s14  ;;  %v2473_v41 = vld [vmem:[#allocation5 + $0x2a] sm:$0x1]  ;;  %v3276_v58 = vpack.c.bf16 %v2619_v53, %v2618_v4  ;;  %v3279_v14 = vpack.c.bf16 %v2621_v39, %v2620_v3  ;;  %v2622_v30 = vld [vmem:[%s4561_s1 + $0xe8] sm:$0xff] }
 0x333   : > { %v3282_v48 = vpack.c.bf16 %v2623_v26, %v2622_v30 }
 0x336   : > { %2491 = vrot.lane.b32.xlu1 %v2473_v41, %s3424_s17  ;;  %v2624_v41 = vld [vmem:[%s4561_s1 + $0xf8] sm:$0xff] }
 0x337   : > { %v3285_v21 = vpack.c.bf16 %v2625_v10, %v2624_v41 }
 0x339   : > { %v2344_v23 = vld [vmem:[#allocation4 + $0x50] sm:$0xff] }
 0x33a   : > { %v2359_v0 = vld [vmem:[#allocation4 + $0x51] sm:$0xff] }
 0x33b   : > { %v3158_v18 = vpop.f32.mrb[18].mxu1  ;;  %v2374_v9 = vmax.f32 %v2344_v23, %v2359_v0  ;;  %v2704_v23 = vld [vmem:[%s4561_s1 + $0x118] sm:$0xff]  ;;  %v2705_v0 = vld [vmem:[%s4561_s1 + $0x120] sm:$0xff] }
 0x33c   : > { %v2293_v42 = vadd.f32 %v3158_v18, %v4314_v51  ;;  %v2287_v2 = vpop.f32.mrb[19].mxu1 }
 0x33d   : > { %v2288_v22 = vadd.f32 %v4314_v51, %v2287_v2 }
 0x33e   : > { %2329 = vst.msk [vmem:[#allocation4 + $0x68] sm:$0xff] %vm1957_vm6, %v2293_v42 }
 0x33f   : > { %2328 = vst.msk [vmem:[#allocation4 + $0x60] sm:$0xff] %vm1957_vm6, %v2288_v22 }
 0x344   : > { %v2480_v20 = vpop.permute.xlu1 %2479  ;;  %v2484_v57 = vpop.permute.xlu0 %2483 }
 0x345   : > { %v2510_v46 = vsel %vm1957_vm6, %v2469_v19, %v2480_v20 }
 0x346   : > { %v2389_v1 = vld [vmem:[#allocation4 + $0x64] sm:$0xff]  ;;  %v2511_v47 = vsel %vm1995_vm8, %v2510_v46, %v2484_v57  ;;  %vm2782_vm8 = vcmask 73728  }
 0x347   : > { %v2404_v28 = vld [vmem:[#allocation4 + $0x65] sm:$0xff] }
 0x348   : > { %v2419_v62 = vmax.f32 %v2389_v1, %v2404_v28  ;;  %v3291_v1 = vpack.c.bf16 %v2705_v0, %v2704_v23  ;;  %v2706_v28 = vld [vmem:[%s4561_s1 + $0x128] sm:$0xff] }
 0x34a   : > { %v2434_v17 = vmax.f32 %v2374_v9, %v2419_v62 }
 0x34c   : > { %v2449_v35 = vmax.f32 %v2434_v17, 0.0  ;;  %v2707_v17 = vld [vmem:[%s4561_s1 + $0x134] sm:$0x1] }
 0x34e   : > { %2464 = vst.msk [vmem:[#allocation5 + $0x50] sm:$0xff] %vm1957_vm6, %v2449_v35 }
 0x355   : > { %v2476_v8 = vld [vmem:[#allocation5 + $0x52] sm:$0x1]  ;;  %v2475_v37 = vld [vmem:[#allocation5 + $0x50] sm:$0x1]  ;;  %v2477_v59 = vld [vmem:[#allocation5 + $0x54] sm:$0x1] }
 0x356   : > { %2503 = vrot.lane.b32.xlu0 %v2476_v8, %s3429_s21  ;;  %2499 = vrot.lane.b32.xlu1 %v2475_v37, %s3430_s22 }
 0x35a   : > { %2507 = vrot.lane.b32.xlu1 %v2477_v59, %s3431_s23  ;;  %s2933_s23 = sshll.u32 %s3469_s13, 4  ;;  %s3432_s13 = smov [#allocation6]  }
 0x35b   : > { %s4518_s4 = scalar_lea.hbm %s4562_s2, %s2933_s23  ;;  %s3356_s16 = sshll.u32 %s3432_s13, 4  ;;  %s3357_s16 = int_to_ptr.vmem [resolvable:$false] %s3356_s16 }
 0x35c   : > { %s3358_s14 = scalar_lea.vmem %s3357_s16, 32  ;;  %p3359_p0 = scmp.lt.s32.totalorder %s4520_s25, %s3357_s16 }
 0x35d   : > { %p3360_p1 = scmp.lt.s32.totalorder %s3358_s14, %s3352_s8 }
 0x35f   : > { %p3361_p2 = por %p3360_p1, %p3359_p0 }
 0x361   : > { %p3362_p3 = pnand %p3361_p2, %p3355_p13 }
 0x376   : > { %v3161_v7 = vpop.f32.mrb[20].mxu1 }
 0x377   : > { %v2303_v13 = vadd.f32 %v3161_v7, %v4314_v51  ;;  %v2297_v33 = vpop.f32.mrb[21].mxu1 }
 0x378   : > { %v2298_v49 = vadd.f32 %v4314_v51, %v2297_v33 }
 0x379   : > { %2331 = vst.msk [vmem:[#allocation4 + $0x78] sm:$0xff] %vm1957_vm6, %v2303_v13 }
 0x37a   : > { %2330 = vst.msk [vmem:[#allocation4 + $0x70] sm:$0xff] %vm1957_vm6, %v2298_v49 }
 0x37f   : > { %v3164_v11 = vpop.f32.mrb[22].mxu1 }
 0x380   : > { %v2313_v24 = vadd.f32 %v3164_v11, %v4314_v51  ;;  %v2307_v61 = vpop.f32.mrb[23].mxu1 }
 0x381   : > { %v2308_v6 = vadd.f32 %v4314_v51, %v2307_v61 }
 0x382   : > { %2333 = vst.msk [vmem:[#allocation4 + $0x88] sm:$0xff] %vm1957_vm6, %v2313_v24 }
 0x383   : > { %2332 = vst.msk [vmem:[#allocation4 + $0x80] sm:$0xff] %vm1957_vm6, %v2308_v6  ;;  %vm2627_vm6 = vcmask 654336  }
 0x3a4   : > { %v2488_v44 = vpop.permute.xlu1 %2487  ;;  %v2496_v29 = vpop.permute.xlu0 %2495 }
 0x3a5   : > { %v2512_v55 = vsel %vm2033_vm10, %v2511_v47, %v2488_v44 }
 0x3a8   : > { %v2492_v45 = vpop.permute.xlu1 %2491 }
 0x3a9   : > { %v2513_v16 = vsel %vm2071_vm12, %v2512_v55, %v2492_v45 }
 0x3aa   : > { %v2515_v25 = vsel %vm2514_vm1, %v2513_v16, %v2496_v29 }
 0x3c8   : > { %v2500_v51 = vpop.permute.xlu1 %2499  ;;  %v2504_v27 = vpop.permute.xlu0 %2503 }
 0x3c9   : > { %v2517_v5 = vsel %vm2516_vm2, %v2515_v25, %v2500_v51 }
 0x3ca   : > { %v2519_v12 = vsel %vm2518_vm3, %v2517_v5, %v2504_v27 }
 0x3cc   : > { %v2508_v54 = vpop.permute.xlu1 %2507 }
 0x3cd   : > { %v2521_v52 = vsel %vm2520_vm4, %v2519_v12, %v2508_v54 }
 0x3ce   : > { %3194 = vmatmul.mubr.msk.f32.vlgmr.msra.gmra.mrb[24].mxu1 %vm2537_vm5, %v2521_v52 }
 0x3cf   : > { %3274 = vmatpush3.bf16.msra.mxu1 %v3273_v60  ;;  %3216 = vmatprep.mubr.msk.f32.mxu1 %vm3427_vm0, %v3428_v38 }
 0x3d0   : > { %3275 = vmatprep.subr.bf16.mxu1 %v3425_v63 }
 0x3d3   : > { %3277 = vmatpush3.bf16.msra.mxu1 %v3276_v58 }
 0x3d4   : > { %3278 = vmatprep.subr.bf16.mxu1 %v3425_v63 }
 0x3d7   : > { %3280 = vmatpush3.bf16.msra.mxu1 %v3279_v14 }
 0x3d8   : > { %3281 = vmatprep.subr.bf16.mxu1 %v3425_v63 }
 0x3db   : > { %3283 = vmatpush3.bf16.msra.mxu1 %v3282_v48 }
 0x3dc   : > { %3284 = vmatprep.subr.bf16.mxu1 %v3425_v63 }
 0x3df   : > { %3286 = vmatpush3.bf16.msra.mxu1 %v3285_v21 }
 0x3e0   : > { %3287 = vmatprep.subr.bf16.mxu1 %v3425_v63 }
 0x4a1   : > { %v2611_v18 = vpop.f32.mrb[24].mxu1 }
 0x4a2   : > { %v2612_v42 = vadd.f32 %v2611_v18, %v2536_v15  ;;  %v3195_v2 = vpop.f32.mrb[25].mxu1 }
 0x4a4   : > { %v2615_v22 = vmax.f32 %v2612_v42, 0.0 }
 0x4a6   : > { %3217 = vmatmul.mubr.msk.f32.vlgmr.msra.gmra.mrb[26].mxu1 %vm2627_vm6, %v2615_v22 }
 0x4a7   : > { %3289 = vmatpush3.bf16.msra.mxu1 %v3288_v50  ;;  %3229 = vmatprep.mubr.msk.f32.mxu1 %vm3427_vm0, %v3428_v38 }
 0x4a8   : > { %3290 = vmatprep.subr.bf16.mxu1 %v3425_v63  ;;  %v2626_v63 = vld [vmem:[%s4561_s1 + $0x133] sm:$0x1] }
 0x4ab   : > { %3292 = vmatpush3.bf16.msra.mxu1 %v3291_v1 }
 0x4ac   : > { %3227 = vmatprep.subr.mxu1 %v3428_v38 }
 0x4af   : > { %3228 = vmatpush3.msra.mxu1 %v2706_v28 }
 0x579   : > { %v2697_v9 = vpop.f32.mrb[26].mxu1 }
 0x57a   : > { %v2698_v62 = vadd.f32 %v2697_v9, %v2626_v63  ;;  %v3218_v36 = vpop.f32.mrb[27].mxu1 }
 0x57c   : > { %v2701_v31 = vmax.f32 %v2698_v62, 0.0 }
 0x57e   : > { %3230 = vmatmul.mubr.msk.f32.vlgmr.msra.gmra.mrb[28].mxu1 %vm2708_vm7, %v2701_v31 }
 0x651   : > { %v2778_v32 = vpop.f32.mrb[28].mxu1 }
 0x652   : > { %v2779_v35 = vadd.f32 %v2778_v32, %v2707_v17  ;;  %v3231_v38 = vpop.f32.mrb[29].mxu1 }
 0x654   : > { %2783 = vst.msk [vmem:[%s136_s24] sm:$0x1] %vm2782_vm8, %v2779_v35 }
 0x655   : > { %3365 = shalt.err (!%p3362_p3)
}
 0x656   : > { %s3366_s26 = scalar_lea.hbm %s4518_s4, 16  ;;  %s3370_s17 = scalar_lea.hbm %s4562_s2, 32 }
 0x657   : > { %p3367_p4 = scmp.ne.s32.totalorder %s4518_s4, %s3366_s26  ;;  %p3371_p9 = scmp.lt.u32.totalorder %s4518_s4, %s4562_s2 }
 0x658   : > { %p3372_p10 = scmp.lt.u32.totalorder %s3370_s17, %s3366_s26  ;;  %p3374_p12 = scmp.lt.u32.totalorder %s3366_s26, %s4518_s4 }
 0x659   : > { %p3368_p7 = pnand %p3367_p4, %p3486_p5 }
 0x65a   : > { %p3373_p11 = por %p3372_p10, %p3371_p9 }
 0x65b   : > { %p3369_p8 = pneg %p3368_p7 }
 0x65c   : > { %p3375_p13 = por %p3374_p12, %p3373_p11 }
 0x65e   : > { %p3376_p0 = pnand %p3375_p13, %p3369_p8 }
 0x660   : > { %3379 = shalt.err (!%p3376_p0)
}
 0x661   : > { %3295 = dma.vmem_to_hbm [thread:$0]  (%p3486_p5), %s4520_s25, 16, %s4518_s4, %s2785_s7  }
 0x662 PF: > { %p3301_p1 = scmp.ge.s32.totalorder %s3414_s12, 2  ;;  %s2809_s3 = sand.u32 1, %s3402_s9  }
 0x663   : > { %s2810_s21 = scalar_lea.sflag [#allocation7], %s2809_s3 }
 0x664   : > { %p3298_p2 = pnand %p3301_p1, %p3490_p6 }
 0x666   : > { %3397 = dma.done.wait (!%p3298_p2), %s2810_s21, 16  }
 0x667   : > { %3399 = vsyncadd (!%p3298_p2), %s2810_s21, 4294967280  ;;  %p12_p3 = scmp.ge.s32.totalorder %s3473_s15, 4   ;;  %s4565_s9 = smov %s3406_s10 }
 0x668   : > { %s4566_s10 = smov %s3410_s11  ;;  %s4567_s11 = smov %s3484_s18 }
 0x669   : > { %s4568_s12 = smov %s3473_s15  ;;  %14 = sbr.rel (!%p12_p3) target bundleno = 3 (0x3), region = 185 }
 0x670   :  { %2814 = vsyncpa [#allocation7], 1 }
 0x671   :  { %2816 = vsyncpa [#allocation7 + $0x1], 1 }

</bundles_post_ra>
